<compile_context>
chip_gen: v6e
topology: v6e:2x2x1
jax: 0.10.0
libtpu: 0.0.40
codegen_flags: <defaults>
</compile_context>

<pallas_src>
import functools
import math

import jax
import jax.numpy as jnp
from jax import lax
from jax.experimental import pallas as pl
from jax.experimental.pallas import tpu as pltpu

# ----------------------------- configuration --------------------------------
D_MODEL = 128            # d_model: multiple of 128 -> lane-dense vregs
NHEAD = 4
HEAD_DIM = D_MODEL // NHEAD
DIM_FF = 256             # dim_feedforward (scaled down from 2048)
LN_EPS = 1e-5            # nn.LayerNorm default eps
L_TGT = 16               # tgt sequence length
S_MEM = 32               # memory sequence length
BATCH = 2
VMEM_LIMIT = 32 * 1024 * 1024      # explicit scoped-VMEM limit (way above need)


# ----------------------------- in-kernel helpers -----------------------------

def _layernorm(x, gamma, beta, eps):
    mu = jnp.mean(x, axis=-1, keepdims=True)
    var = jnp.mean(jnp.square(x - mu), axis=-1, keepdims=True)
    return (x - mu) * lax.rsqrt(var + eps) * gamma + beta


def _mm(a, w):
    """MXU matmul, f32 operands, f32 accumulate."""
    return jnp.dot(a, w, preferred_element_type=jnp.float32)


def _mha(q, k, v, *, nhead):
    """Multi-head attention core.

    q: (L, D), k/v: (S, D) full-width projections; returns (L, D) (pre out-proj).
    """
    L, D = q.shape
    S = k.shape[0]
    hd = D // nhead
    scale = 1.0 / math.sqrt(hd)       # PyTorch scales q by 1/sqrt(head_dim)

    # Per-head scores stacked to (H*L, S): one softmax over fuller vregs instead
    # of nhead tiny ones.  dot_general contracts the last dims of q_h and k_h so
    # no kh.T materializes.
    s = jnp.concatenate(
        [lax.dot_general(q[:, h * hd:(h + 1) * hd],
                         k[:, h * hd:(h + 1) * hd],
                         (((1,), (1,)), ((), ())),
                         preferred_element_type=jnp.float32)
         for h in range(nhead)], axis=0) * scale                # (H*L, S)
    s = s - jnp.max(s, axis=-1, keepdims=True)
    p = jnp.exp(s)
    p = p / jnp.sum(p, axis=-1, keepdims=True)

    # Per-head (L,S)@(S,hd), lane-concat back to (L, D) so the output projection
    # is a single full-width matmul in the caller.
    return jnp.concatenate(
        [_mm(p[h * L:(h + 1) * L], v[:, h * hd:(h + 1) * hd])
         for h in range(nhead)], axis=1)                        # (L, D)


# ------------------------- fully fused decoder layer -------------------------

def _decoder_layer_kernel(*refs, nhead, eps, has_qpos, has_kpos):
    it = iter(refs)
    x_ref = next(it)
    mem_ref = next(it)
    qpos_ref = next(it) if has_qpos else None
    kpos_ref = next(it) if has_kpos else None
    (n1g, n1b, sa_wqk, sa_wv, sa_wo,
     n2g, n2b, ca_wq, ca_wk, ca_wv, ca_wo,
     n3g, n3b, w1, b1, w2, b2, o_ref) = it

    D = x_ref.shape[-1]
    x = x_ref[0]                                    # (L, D) residual stream
    mem = mem_ref[0]                                # (S, D)
    qpos = qpos_ref[0] if has_qpos else None
    kpos = kpos_ref[0] if has_kpos else None

    # ---- self-attention residual block: norm1 -> MHA(q=k=tgt2+qpos, v=tgt2) -> +x
    xn = _layernorm(x, n1g[...], n1b[...], eps)
    q_in = xn + qpos if has_qpos else xn            # with_pos_embed(tgt2, query_pos)
    qk = _mm(q_in, sa_wqk[...])                     # fused [Wq|Wk] -> (L, 2D)
    v = _mm(xn, sa_wv[...])                         # value = norm1(tgt)
    a = _mha(qk[:, :D], qk[:, D:], v, nhead=nhead)
    x = x + _mm(a, sa_wo[...])                      # dropout1 = identity (eval)

    # ---- cross-attention residual block: norm2 -> MHA(q=tgt2+qpos, k=mem+pos, v=mem) -> +x
    xn = _layernorm(x, n2g[...], n2b[...], eps)
    q_in = xn + qpos if has_qpos else xn
    k_in = mem + kpos if has_kpos else mem
    q = _mm(q_in, ca_wq[...])
    k = _mm(k_in, ca_wk[...])
    v = _mm(mem, ca_wv[...])                        # value = memory (un-normed)
    a = _mha(q, k, v, nhead=nhead)
    x = x + _mm(a, ca_wo[...])                      # dropout2 = identity (eval)

    # ---- feed-forward residual block: norm3 -> linear1 -> relu -> linear2 -> +x
    xn = _layernorm(x, n3g[...], n3b[...], eps)
    h = jnp.maximum(_mm(xn, w1[...]) + b1[...], 0.0)     # activation='relu'
    x = x + _mm(h, w2[...]) + b2[...]               # dropout/dropout3 = identity

    o_ref[0] = x


def transformer_decoder_layer(params, tgt, memory, pos=None, query_pos=None):
    """TransformerDecoderLayer.forward (eval mode).

    tgt: (L, B, D), memory: (S, B, D), pos: (S, B, D) or None,
    query_pos: (L, B, D) or None.  Returns (L, B, D) float32.
    """
    L, B, D = tgt.shape
    S = memory.shape[0]
    F = params["lin1_w"].shape[1]
    has_qpos = query_pos is not None
    has_kpos = pos is not None

    to_bld = lambda a: jnp.transpose(a, (1, 0, 2)).astype(jnp.float32)
    x = to_bld(tgt)
    mem = to_bld(memory)

    kernel = functools.partial(_decoder_layer_kernel, nhead=NHEAD, eps=LN_EPS,
                               has_qpos=has_qpos, has_kpos=has_kpos)

    in_specs = [pl.BlockSpec((1, L, D), lambda b: (b, 0, 0)),     # tgt
                pl.BlockSpec((1, S, D), lambda b: (b, 0, 0))]     # memory
    args = [x, mem]
    if has_qpos:
        in_specs.append(pl.BlockSpec((1, L, D), lambda b: (b, 0, 0)))
        args.append(to_bld(query_pos))
    if has_kpos:
        in_specs.append(pl.BlockSpec((1, S, D), lambda b: (b, 0, 0)))
        args.append(to_bld(pos))

    weights = [
        params["norm1_g"].reshape(1, D), params["norm1_b"].reshape(1, D),
        params["sa_wqk"], params["sa_wv"], params["sa_wo"],
        params["norm2_g"].reshape(1, D), params["norm2_b"].reshape(1, D),
        params["ca_wq"], params["ca_wk"], params["ca_wv"], params["ca_wo"],
        params["norm3_g"].reshape(1, D), params["norm3_b"].reshape(1, D),
        params["lin1_w"], params["lin1_b"].reshape(1, F),
        params["lin2_w"], params["lin2_b"].reshape(1, D),
    ]
    for w in weights:
        # Constant index_map -> weight blocks are not re-fetched between steps.
        in_specs.append(pl.BlockSpec(w.shape, lambda b: (0, 0)))
    args += weights

    flops = 2 * B * (
        L * D * 2 * D + L * D * D + L * D * D      # self-attn: [Wq|Wk], V, out-proj
        + 2 * L * L * D                            # self-attn: scores + attn@V
        + L * D * D + 2 * S * D * D + L * D * D    # cross-attn: Q, K, V, out-proj
        + 2 * L * S * D                            # cross-attn: scores + attn@V
        + 2 * L * D * F)                           # FFN
    bytes_accessed = int(sum(int(a.size) * a.dtype.itemsize for a in args)
                         + B * L * D * 4)
    cost = pl.CostEstimate(flops=int(flops),
                           transcendentals=int(B * NHEAD * L * (L + S)),
                           bytes_accessed=bytes_accessed)

    out = pl.pallas_call(
        kernel,
        grid=(B,),
        in_specs=in_specs,
        out_specs=pl.BlockSpec((1, L, D), lambda b: (b, 0, 0)),
        out_shape=jax.ShapeDtypeStruct((B, L, D), jnp.float32),
        compiler_params=pltpu.CompilerParams(
            dimension_semantics=("parallel",),   # 2 batch steps -> both TCs on v7x
            vmem_limit_bytes=VMEM_LIMIT),
        cost_estimate=cost,
    )(*args)

    return jnp.transpose(out, (1, 0, 2))          # back to (L, B, D)


# ------------------------------ initialization --------------------------------

def init_params(key):
    keys = iter(jax.random.split(key, 12))

    def mha_weights():
        # PyTorch packs Wq/Wk/Wv into in_proj_weight (3D, D), xavier_uniform init;
        # out_proj is (D, D); bias=False everywhere (module uses bias=False).
        # Stored pre-transposed for x @ W layout.
        bound_in = math.sqrt(6.0 / (3 * D_MODEL + D_MODEL))
        w_in = jax.random.uniform(next(keys), (3 * D_MODEL, D_MODEL),
                                  jnp.float32, -bound_in, bound_in)
        wq = w_in[:D_MODEL].T
        wk = w_in[D_MODEL:2 * D_MODEL].T
        wv = w_in[2 * D_MODEL:].T
        bound_o = 1.0 / math.sqrt(D_MODEL)
        wo = jax.random.uniform(next(keys), (D_MODEL, D_MODEL), jnp.float32,
                                -bound_o, bound_o).T
        return wq, wk, wv, wo

    sa_wq, sa_wk, sa_wv, sa_wo = mha_weights()
    ca_wq, ca_wk, ca_wv, ca_wo = mha_weights()

    def linear(cin, cout):
        bound = 1.0 / math.sqrt(cin)
        w = jax.random.uniform(next(keys), (cin, cout), jnp.float32, -bound, bound)
        b = jax.random.uniform(next(keys), (cout,), jnp.float32, -bound, bound)
        return w, b

    lin1_w, lin1_b = linear(D_MODEL, DIM_FF)
    lin2_w, lin2_b = linear(DIM_FF, D_MODEL)

    ones = jnp.ones((D_MODEL,), jnp.float32)
    zeros = jnp.zeros((D_MODEL,), jnp.float32)
    return dict(
        norm1_g=ones, norm1_b=zeros,
        norm2_g=ones, norm2_b=zeros,
        norm3_g=ones, norm3_b=zeros,
        sa_wqk=jnp.concatenate([sa_wq, sa_wk], axis=1),   # fused [Wq|Wk] (D, 2D)
        sa_wv=sa_wv, sa_wo=sa_wo,
        ca_wq=ca_wq, ca_wk=ca_wk, ca_wv=ca_wv, ca_wo=ca_wo,
        lin1_w=lin1_w, lin1_b=lin1_b, lin2_w=lin2_w, lin2_b=lin2_b,
    )


if __name__ == "__main__":
    root = jax.random.PRNGKey(0)
    kp, kt, km, kqp, kkp = jax.random.split(root, 5)
    params = init_params(kp)

    tgt = jax.random.normal(kt, (L_TGT, BATCH, D_MODEL), jnp.float32)
    memory = jax.random.normal(km, (S_MEM, BATCH, D_MODEL), jnp.float32)
    query_pos = jax.random.normal(kqp, (L_TGT, BATCH, D_MODEL), jnp.float32)
    pos = jax.random.normal(kkp, (S_MEM, BATCH, D_MODEL), jnp.float32)

    fwd = jax.jit(transformer_decoder_layer)
    out = jax.block_until_ready(fwd(params, tgt, memory, pos, query_pos))

    assert out.shape == (L_TGT, BATCH, D_MODEL), out.shape
    assert out.dtype == jnp.float32
    assert bool(jnp.all(jnp.isfinite(out)))
    print("KERNEL_OK")
</pallas_src>

<mosaic_0001>
module attributes {stable_mosaic.version = 11 : i64} {
  func.func @_decoder_layer_kernel(%arg0: i32, %arg1: memref<1x16x128xf32, #tpu.memory_space<vmem>>, %arg2: memref<1x32x128xf32, #tpu.memory_space<vmem>>, %arg3: memref<1x16x128xf32, #tpu.memory_space<vmem>>, %arg4: memref<1x32x128xf32, #tpu.memory_space<vmem>>, %arg5: memref<1x128xf32, #tpu.memory_space<vmem>>, %arg6: memref<1x128xf32, #tpu.memory_space<vmem>>, %arg7: memref<128x256xf32, #tpu.memory_space<vmem>>, %arg8: memref<128x128xf32, #tpu.memory_space<vmem>>, %arg9: memref<128x128xf32, #tpu.memory_space<vmem>>, %arg10: memref<1x128xf32, #tpu.memory_space<vmem>>, %arg11: memref<1x128xf32, #tpu.memory_space<vmem>>, %arg12: memref<128x128xf32, #tpu.memory_space<vmem>>, %arg13: memref<128x128xf32, #tpu.memory_space<vmem>>, %arg14: memref<128x128xf32, #tpu.memory_space<vmem>>, %arg15: memref<128x128xf32, #tpu.memory_space<vmem>>, %arg16: memref<1x128xf32, #tpu.memory_space<vmem>>, %arg17: memref<1x128xf32, #tpu.memory_space<vmem>>, %arg18: memref<128x256xf32, #tpu.memory_space<vmem>>, %arg19: memref<1x256xf32, #tpu.memory_space<vmem>>, %arg20: memref<256x128xf32, #tpu.memory_space<vmem>>, %arg21: memref<1x128xf32, #tpu.memory_space<vmem>>, %arg22: memref<1x16x128xf32, #tpu.memory_space<vmem>>) attributes {dimension_semantics = [#tpu.dimension_semantics<parallel>], iteration_bounds = array<i64: 2>, scalar_prefetch = 0 : i64, scratch_operands = 0 : i64, tpu.core_type = #tpu.core_type<tc>, window_params = [{transform_indices = @transform_0, window_bounds = array<i64: 1, 16, 128>}, {transform_indices = @transform_1, window_bounds = array<i64: 1, 32, 128>}, {transform_indices = @transform_2, window_bounds = array<i64: 1, 16, 128>}, {transform_indices = @transform_3, window_bounds = array<i64: 1, 32, 128>}, {pipeline_mode = #tpu.pipeline_mode<synchronous>, transform_indices = @transform_4, window_bounds = array<i64: 1, 128>}, {pipeline_mode = #tpu.pipeline_mode<synchronous>, transform_indices = @transform_5, window_bounds = array<i64: 1, 128>}, {pipeline_mode = #tpu.pipeline_mode<synchronous>, transform_indices = @transform_6, window_bounds = array<i64: 128, 256>}, {pipeline_mode = #tpu.pipeline_mode<synchronous>, transform_indices = @transform_7, window_bounds = array<i64: 128, 128>}, {pipeline_mode = #tpu.pipeline_mode<synchronous>, transform_indices = @transform_8, window_bounds = array<i64: 128, 128>}, {pipeline_mode = #tpu.pipeline_mode<synchronous>, transform_indices = @transform_9, window_bounds = array<i64: 1, 128>}, {pipeline_mode = #tpu.pipeline_mode<synchronous>, transform_indices = @transform_10, window_bounds = array<i64: 1, 128>}, {pipeline_mode = #tpu.pipeline_mode<synchronous>, transform_indices = @transform_11, window_bounds = array<i64: 128, 128>}, {pipeline_mode = #tpu.pipeline_mode<synchronous>, transform_indices = @transform_12, window_bounds = array<i64: 128, 128>}, {pipeline_mode = #tpu.pipeline_mode<synchronous>, transform_indices = @transform_13, window_bounds = array<i64: 128, 128>}, {pipeline_mode = #tpu.pipeline_mode<synchronous>, transform_indices = @transform_14, window_bounds = array<i64: 128, 128>}, {pipeline_mode = #tpu.pipeline_mode<synchronous>, transform_indices = @transform_15, window_bounds = array<i64: 1, 128>}, {pipeline_mode = #tpu.pipeline_mode<synchronous>, transform_indices = @transform_16, window_bounds = array<i64: 1, 128>}, {pipeline_mode = #tpu.pipeline_mode<synchronous>, transform_indices = @transform_17, window_bounds = array<i64: 128, 256>}, {pipeline_mode = #tpu.pipeline_mode<synchronous>, transform_indices = @transform_18, window_bounds = array<i64: 1, 256>}, {pipeline_mode = #tpu.pipeline_mode<synchronous>, transform_indices = @transform_19, window_bounds = array<i64: 256, 128>}, {pipeline_mode = #tpu.pipeline_mode<synchronous>, transform_indices = @transform_20, window_bounds = array<i64: 1, 128>}, {transform_indices = @transform_21, window_bounds = array<i64: 1, 16, 128>}]} {
    %c0 = arith.constant 0 : index
    %c0_0 = arith.constant 0 : index
    %c0_1 = arith.constant 0 : index
    %0 = vector.load %arg1[%c0, %c0_0, %c0_1] : memref<1x16x128xf32, #tpu.memory_space<vmem>>, vector<1x16x128xf32>
    %1 = vector.shape_cast %0 : vector<1x16x128xf32> to vector<16x128xf32>
    %c0_2 = arith.constant 0 : index
    %c0_3 = arith.constant 0 : index
    %c0_4 = arith.constant 0 : index
    %2 = vector.load %arg2[%c0_2, %c0_3, %c0_4] : memref<1x32x128xf32, #tpu.memory_space<vmem>>, vector<1x32x128xf32>
    %3 = vector.shape_cast %2 : vector<1x32x128xf32> to vector<32x128xf32>
    %c0_5 = arith.constant 0 : index
    %c0_6 = arith.constant 0 : index
    %c0_7 = arith.constant 0 : index
    %4 = vector.load %arg3[%c0_5, %c0_6, %c0_7] : memref<1x16x128xf32, #tpu.memory_space<vmem>>, vector<1x16x128xf32>
    %5 = vector.shape_cast %4 : vector<1x16x128xf32> to vector<16x128xf32>
    %c0_8 = arith.constant 0 : index
    %c0_9 = arith.constant 0 : index
    %c0_10 = arith.constant 0 : index
    %6 = vector.load %arg4[%c0_8, %c0_9, %c0_10] : memref<1x32x128xf32, #tpu.memory_space<vmem>>, vector<1x32x128xf32>
    %7 = vector.shape_cast %6 : vector<1x32x128xf32> to vector<32x128xf32>
    %c0_11 = arith.constant 0 : index
    %c0_12 = arith.constant 0 : index
    %8 = vector.load %arg5[%c0_11, %c0_12] : memref<1x128xf32, #tpu.memory_space<vmem>>, vector<1x128xf32>
    %c0_13 = arith.constant 0 : index
    %c0_14 = arith.constant 0 : index
    %9 = vector.load %arg6[%c0_13, %c0_14] : memref<1x128xf32, #tpu.memory_space<vmem>>, vector<1x128xf32>
    %cst = arith.constant dense<0.000000e+00> : vector<16xf32>
    %10 = vector.multi_reduction <add>, %1, %cst [1] : vector<16x128xf32> to vector<16xf32>
    %11 = vector.shape_cast %10 : vector<16xf32> to vector<16x1xf32>
    %cst_15 = arith.constant 1.280000e+02 : f32
    %12 = vector.broadcast %cst_15 : f32 to vector<16x1xf32>
    %13 = arith.divf %11, %12 : vector<16x1xf32>
    %14 = vector.broadcast %13 : vector<16x1xf32> to vector<16x128xf32>
    %15 = arith.subf %1, %14 : vector<16x128xf32>
    %16 = arith.mulf %15, %15 : vector<16x128xf32>
    %cst_16 = arith.constant dense<0.000000e+00> : vector<16xf32>
    %17 = vector.multi_reduction <add>, %16, %cst_16 [1] : vector<16x128xf32> to vector<16xf32>
    %18 = vector.shape_cast %17 : vector<16xf32> to vector<16x1xf32>
    %cst_17 = arith.constant 1.280000e+02 : f32
    %19 = vector.broadcast %cst_17 : f32 to vector<16x1xf32>
    %20 = arith.divf %18, %19 : vector<16x1xf32>
    %21 = vector.broadcast %13 : vector<16x1xf32> to vector<16x128xf32>
    %22 = arith.subf %1, %21 : vector<16x128xf32>
    %cst_18 = arith.constant 9.99999974E-6 : f32
    %23 = vector.broadcast %cst_18 : f32 to vector<16x1xf32>
    %24 = arith.addf %20, %23 : vector<16x1xf32>
    %25 = math.rsqrt %24 : vector<16x1xf32>
    %26 = vector.broadcast %25 : vector<16x1xf32> to vector<16x128xf32>
    %27 = arith.mulf %22, %26 : vector<16x128xf32>
    %28 = vector.broadcast %8 : vector<1x128xf32> to vector<16x128xf32>
    %29 = arith.mulf %27, %28 : vector<16x128xf32>
    %30 = vector.broadcast %9 : vector<1x128xf32> to vector<16x128xf32>
    %31 = arith.addf %29, %30 : vector<16x128xf32>
    %32 = arith.addf %31, %5 : vector<16x128xf32>
    %c0_19 = arith.constant 0 : index
    %c0_20 = arith.constant 0 : index
    %33 = vector.load %arg7[%c0_19, %c0_20] : memref<128x256xf32, #tpu.memory_space<vmem>>, vector<128x256xf32>
    %cst_21 = arith.constant dense<0.000000e+00> : vector<16x256xf32>
    %34 = tpu.matmul %32, %33, %cst_21 {dimension_numbers = #tpu.dot_dimension_numbers<[1], [0], [0], [1], [0, 0, 1, 1], [], []>} : vector<16x128xf32>, vector<128x256xf32>, vector<16x256xf32> -> vector<16x256xf32>
    %c0_22 = arith.constant 0 : index
    %c0_23 = arith.constant 0 : index
    %35 = vector.load %arg8[%c0_22, %c0_23] : memref<128x128xf32, #tpu.memory_space<vmem>>, vector<128x128xf32>
    %cst_24 = arith.constant dense<0.000000e+00> : vector<16x128xf32>
    %36 = tpu.matmul %31, %35, %cst_24 {dimension_numbers = #tpu.dot_dimension_numbers<[1], [0], [0], [1], [0, 0, 1, 1], [], []>} : vector<16x128xf32>, vector<128x128xf32>, vector<16x128xf32> -> vector<16x128xf32>
    %37 = vector.extract_strided_slice %34 {offsets = [0, 0], sizes = [16, 128], strides = [1, 1]} : vector<16x256xf32> to vector<16x128xf32>
    %38 = vector.extract_strided_slice %34 {offsets = [0, 128], sizes = [16, 128], strides = [1, 1]} : vector<16x256xf32> to vector<16x128xf32>
    %39 = vector.extract_strided_slice %37 {offsets = [0, 0], sizes = [16, 32], strides = [1, 1]} : vector<16x128xf32> to vector<16x32xf32>
    %40 = vector.extract_strided_slice %38 {offsets = [0, 0], sizes = [16, 32], strides = [1, 1]} : vector<16x128xf32> to vector<16x32xf32>
    %cst_25 = arith.constant dense<0.000000e+00> : vector<16x16xf32>
    %41 = tpu.matmul %39, %40, %cst_25 {dimension_numbers = #tpu.dot_dimension_numbers<[1], [1], [0], [0], [0, 0, 1, 0], [], []>} : vector<16x32xf32>, vector<16x32xf32>, vector<16x16xf32> -> vector<16x16xf32>
    %42 = vector.extract_strided_slice %37 {offsets = [0, 32], sizes = [16, 32], strides = [1, 1]} : vector<16x128xf32> to vector<16x32xf32>
    %43 = vector.extract_strided_slice %38 {offsets = [0, 32], sizes = [16, 32], strides = [1, 1]} : vector<16x128xf32> to vector<16x32xf32>
    %cst_26 = arith.constant dense<0.000000e+00> : vector<16x16xf32>
    %44 = tpu.matmul %42, %43, %cst_26 {dimension_numbers = #tpu.dot_dimension_numbers<[1], [1], [0], [0], [0, 0, 1, 0], [], []>} : vector<16x32xf32>, vector<16x32xf32>, vector<16x16xf32> -> vector<16x16xf32>
    %45 = vector.extract_strided_slice %37 {offsets = [0, 64], sizes = [16, 32], strides = [1, 1]} : vector<16x128xf32> to vector<16x32xf32>
    %46 = vector.extract_strided_slice %38 {offsets = [0, 64], sizes = [16, 32], strides = [1, 1]} : vector<16x128xf32> to vector<16x32xf32>
    %cst_27 = arith.constant dense<0.000000e+00> : vector<16x16xf32>
    %47 = tpu.matmul %45, %46, %cst_27 {dimension_numbers = #tpu.dot_dimension_numbers<[1], [1], [0], [0], [0, 0, 1, 0], [], []>} : vector<16x32xf32>, vector<16x32xf32>, vector<16x16xf32> -> vector<16x16xf32>
    %48 = vector.extract_strided_slice %37 {offsets = [0, 96], sizes = [16, 32], strides = [1, 1]} : vector<16x128xf32> to vector<16x32xf32>
    %49 = vector.extract_strided_slice %38 {offsets = [0, 96], sizes = [16, 32], strides = [1, 1]} : vector<16x128xf32> to vector<16x32xf32>
    %cst_28 = arith.constant dense<0.000000e+00> : vector<16x16xf32>
    %50 = tpu.matmul %48, %49, %cst_28 {dimension_numbers = #tpu.dot_dimension_numbers<[1], [1], [0], [0], [0, 0, 1, 0], [], []>} : vector<16x32xf32>, vector<16x32xf32>, vector<16x16xf32> -> vector<16x16xf32>
    %51 = tpu.concatenate %41, %44, %47, %50 in 0 : vector<16x16xf32>, vector<16x16xf32>, vector<16x16xf32>, vector<16x16xf32> -> vector<64x16xf32>
    %cst_29 = arith.constant 0.176776692 : f32
    %52 = vector.broadcast %cst_29 : f32 to vector<64x16xf32>
    %53 = arith.mulf %51, %52 : vector<64x16xf32>
    %cst_30 = arith.constant dense<0xFF800000> : vector<64xf32>
    %54 = vector.multi_reduction <maximumf>, %53, %cst_30 [1] : vector<64x16xf32> to vector<64xf32>
    %55 = vector.shape_cast %54 : vector<64xf32> to vector<64x1xf32>
    %56 = vector.broadcast %55 : vector<64x1xf32> to vector<64x16xf32>
    %57 = arith.subf %53, %56 : vector<64x16xf32>
    %58 = math.exp %57 : vector<64x16xf32>
    %cst_31 = arith.constant dense<0.000000e+00> : vector<64xf32>
    %59 = vector.multi_reduction <add>, %58, %cst_31 [1] : vector<64x16xf32> to vector<64xf32>
    %60 = vector.shape_cast %59 : vector<64xf32> to vector<64x1xf32>
    %61 = vector.broadcast %60 : vector<64x1xf32> to vector<64x16xf32>
    %62 = arith.divf %58, %61 : vector<64x16xf32>
    %63 = vector.extract_strided_slice %62 {offsets = [0, 0], sizes = [16, 16], strides = [1, 1]} : vector<64x16xf32> to vector<16x16xf32>
    %64 = vector.extract_strided_slice %36 {offsets = [0, 0], sizes = [16, 32], strides = [1, 1]} : vector<16x128xf32> to vector<16x32xf32>
    %cst_32 = arith.constant dense<0.000000e+00> : vector<16x32xf32>
    %65 = tpu.matmul %63, %64, %cst_32 {dimension_numbers = #tpu.dot_dimension_numbers<[1], [0], [0], [1], [0, 0, 1, 1], [], []>} : vector<16x16xf32>, vector<16x32xf32>, vector<16x32xf32> -> vector<16x32xf32>
    %66 = vector.extract_strided_slice %62 {offsets = [16, 0], sizes = [16, 16], strides = [1, 1]} : vector<64x16xf32> to vector<16x16xf32>
    %67 = vector.extract_strided_slice %36 {offsets = [0, 32], sizes = [16, 32], strides = [1, 1]} : vector<16x128xf32> to vector<16x32xf32>
    %cst_33 = arith.constant dense<0.000000e+00> : vector<16x32xf32>
    %68 = tpu.matmul %66, %67, %cst_33 {dimension_numbers = #tpu.dot_dimension_numbers<[1], [0], [0], [1], [0, 0, 1, 1], [], []>} : vector<16x16xf32>, vector<16x32xf32>, vector<16x32xf32> -> vector<16x32xf32>
    %69 = vector.extract_strided_slice %62 {offsets = [32, 0], sizes = [16, 16], strides = [1, 1]} : vector<64x16xf32> to vector<16x16xf32>
    %70 = vector.extract_strided_slice %36 {offsets = [0, 64], sizes = [16, 32], strides = [1, 1]} : vector<16x128xf32> to vector<16x32xf32>
    %cst_34 = arith.constant dense<0.000000e+00> : vector<16x32xf32>
    %71 = tpu.matmul %69, %70, %cst_34 {dimension_numbers = #tpu.dot_dimension_numbers<[1], [0], [0], [1], [0, 0, 1, 1], [], []>} : vector<16x16xf32>, vector<16x32xf32>, vector<16x32xf32> -> vector<16x32xf32>
    %72 = vector.extract_strided_slice %62 {offsets = [48, 0], sizes = [16, 16], strides = [1, 1]} : vector<64x16xf32> to vector<16x16xf32>
    %73 = vector.extract_strided_slice %36 {offsets = [0, 96], sizes = [16, 32], strides = [1, 1]} : vector<16x128xf32> to vector<16x32xf32>
    %cst_35 = arith.constant dense<0.000000e+00> : vector<16x32xf32>
    %74 = tpu.matmul %72, %73, %cst_35 {dimension_numbers = #tpu.dot_dimension_numbers<[1], [0], [0], [1], [0, 0, 1, 1], [], []>} : vector<16x16xf32>, vector<16x32xf32>, vector<16x32xf32> -> vector<16x32xf32>
    %75 = tpu.concatenate %65, %68, %71, %74 in 1 : vector<16x32xf32>, vector<16x32xf32>, vector<16x32xf32>, vector<16x32xf32> -> vector<16x128xf32>
    %c0_36 = arith.constant 0 : index
    %c0_37 = arith.constant 0 : index
    %76 = vector.load %arg9[%c0_36, %c0_37] : memref<128x128xf32, #tpu.memory_space<vmem>>, vector<128x128xf32>
    %cst_38 = arith.constant dense<0.000000e+00> : vector<16x128xf32>
    %77 = tpu.matmul %75, %76, %cst_38 {dimension_numbers = #tpu.dot_dimension_numbers<[1], [0], [0], [1], [0, 0, 1, 1], [], []>} : vector<16x128xf32>, vector<128x128xf32>, vector<16x128xf32> -> vector<16x128xf32>
    %78 = arith.addf %1, %77 : vector<16x128xf32>
    %c0_39 = arith.constant 0 : index
    %c0_40 = arith.constant 0 : index
    %79 = vector.load %arg10[%c0_39, %c0_40] : memref<1x128xf32, #tpu.memory_space<vmem>>, vector<1x128xf32>
    %c0_41 = arith.constant 0 : index
    %c0_42 = arith.constant 0 : index
    %80 = vector.load %arg11[%c0_41, %c0_42] : memref<1x128xf32, #tpu.memory_space<vmem>>, vector<1x128xf32>
    %cst_43 = arith.constant dense<0.000000e+00> : vector<16xf32>
    %81 = vector.multi_reduction <add>, %78, %cst_43 [1] : vector<16x128xf32> to vector<16xf32>
    %82 = vector.shape_cast %81 : vector<16xf32> to vector<16x1xf32>
    %cst_44 = arith.constant 1.280000e+02 : f32
    %83 = vector.broadcast %cst_44 : f32 to vector<16x1xf32>
    %84 = arith.divf %82, %83 : vector<16x1xf32>
    %85 = vector.broadcast %84 : vector<16x1xf32> to vector<16x128xf32>
    %86 = arith.subf %78, %85 : vector<16x128xf32>
    %87 = arith.mulf %86, %86 : vector<16x128xf32>
    %cst_45 = arith.constant dense<0.000000e+00> : vector<16xf32>
    %88 = vector.multi_reduction <add>, %87, %cst_45 [1] : vector<16x128xf32> to vector<16xf32>
    %89 = vector.shape_cast %88 : vector<16xf32> to vector<16x1xf32>
    %cst_46 = arith.constant 1.280000e+02 : f32
    %90 = vector.broadcast %cst_46 : f32 to vector<16x1xf32>
    %91 = arith.divf %89, %90 : vector<16x1xf32>
    %92 = vector.broadcast %84 : vector<16x1xf32> to vector<16x128xf32>
    %93 = arith.subf %78, %92 : vector<16x128xf32>
    %cst_47 = arith.constant 9.99999974E-6 : f32
    %94 = vector.broadcast %cst_47 : f32 to vector<16x1xf32>
    %95 = arith.addf %91, %94 : vector<16x1xf32>
    %96 = math.rsqrt %95 : vector<16x1xf32>
    %97 = vector.broadcast %96 : vector<16x1xf32> to vector<16x128xf32>
    %98 = arith.mulf %93, %97 : vector<16x128xf32>
    %99 = vector.broadcast %79 : vector<1x128xf32> to vector<16x128xf32>
    %100 = arith.mulf %98, %99 : vector<16x128xf32>
    %101 = vector.broadcast %80 : vector<1x128xf32> to vector<16x128xf32>
    %102 = arith.addf %100, %101 : vector<16x128xf32>
    %103 = arith.addf %102, %5 : vector<16x128xf32>
    %104 = arith.addf %3, %7 : vector<32x128xf32>
    %c0_48 = arith.constant 0 : index
    %c0_49 = arith.constant 0 : index
    %105 = vector.load %arg12[%c0_48, %c0_49] : memref<128x128xf32, #tpu.memory_space<vmem>>, vector<128x128xf32>
    %cst_50 = arith.constant dense<0.000000e+00> : vector<16x128xf32>
    %106 = tpu.matmul %103, %105, %cst_50 {dimension_numbers = #tpu.dot_dimension_numbers<[1], [0], [0], [1], [0, 0, 1, 1], [], []>} : vector<16x128xf32>, vector<128x128xf32>, vector<16x128xf32> -> vector<16x128xf32>
    %c0_51 = arith.constant 0 : index
    %c0_52 = arith.constant 0 : index
    %107 = vector.load %arg13[%c0_51, %c0_52] : memref<128x128xf32, #tpu.memory_space<vmem>>, vector<128x128xf32>
    %cst_53 = arith.constant dense<0.000000e+00> : vector<32x128xf32>
    %108 = tpu.matmul %104, %107, %cst_53 {dimension_numbers = #tpu.dot_dimension_numbers<[1], [0], [0], [1], [0, 0, 1, 1], [], []>} : vector<32x128xf32>, vector<128x128xf32>, vector<32x128xf32> -> vector<32x128xf32>
    %c0_54 = arith.constant 0 : index
    %c0_55 = arith.constant 0 : index
    %109 = vector.load %arg14[%c0_54, %c0_55] : memref<128x128xf32, #tpu.memory_space<vmem>>, vector<128x128xf32>
    %cst_56 = arith.constant dense<0.000000e+00> : vector<32x128xf32>
    %110 = tpu.matmul %3, %109, %cst_56 {dimension_numbers = #tpu.dot_dimension_numbers<[1], [0], [0], [1], [0, 0, 1, 1], [], []>} : vector<32x128xf32>, vector<128x128xf32>, vector<32x128xf32> -> vector<32x128xf32>
    %111 = vector.extract_strided_slice %106 {offsets = [0, 0], sizes = [16, 32], strides = [1, 1]} : vector<16x128xf32> to vector<16x32xf32>
    %112 = vector.extract_strided_slice %108 {offsets = [0, 0], sizes = [32, 32], strides = [1, 1]} : vector<32x128xf32> to vector<32x32xf32>
    %cst_57 = arith.constant dense<0.000000e+00> : vector<16x32xf32>
    %113 = tpu.matmul %111, %112, %cst_57 {dimension_numbers = #tpu.dot_dimension_numbers<[1], [1], [0], [0], [0, 0, 1, 0], [], []>} : vector<16x32xf32>, vector<32x32xf32>, vector<16x32xf32> -> vector<16x32xf32>
    %114 = vector.extract_strided_slice %106 {offsets = [0, 32], sizes = [16, 32], strides = [1, 1]} : vector<16x128xf32> to vector<16x32xf32>
    %115 = vector.extract_strided_slice %108 {offsets = [0, 32], sizes = [32, 32], strides = [1, 1]} : vector<32x128xf32> to vector<32x32xf32>
    %cst_58 = arith.constant dense<0.000000e+00> : vector<16x32xf32>
    %116 = tpu.matmul %114, %115, %cst_58 {dimension_numbers = #tpu.dot_dimension_numbers<[1], [1], [0], [0], [0, 0, 1, 0], [], []>} : vector<16x32xf32>, vector<32x32xf32>, vector<16x32xf32> -> vector<16x32xf32>
    %117 = vector.extract_strided_slice %106 {offsets = [0, 64], sizes = [16, 32], strides = [1, 1]} : vector<16x128xf32> to vector<16x32xf32>
    %118 = vector.extract_strided_slice %108 {offsets = [0, 64], sizes = [32, 32], strides = [1, 1]} : vector<32x128xf32> to vector<32x32xf32>
    %cst_59 = arith.constant dense<0.000000e+00> : vector<16x32xf32>
    %119 = tpu.matmul %117, %118, %cst_59 {dimension_numbers = #tpu.dot_dimension_numbers<[1], [1], [0], [0], [0, 0, 1, 0], [], []>} : vector<16x32xf32>, vector<32x32xf32>, vector<16x32xf32> -> vector<16x32xf32>
    %120 = vector.extract_strided_slice %106 {offsets = [0, 96], sizes = [16, 32], strides = [1, 1]} : vector<16x128xf32> to vector<16x32xf32>
    %121 = vector.extract_strided_slice %108 {offsets = [0, 96], sizes = [32, 32], strides = [1, 1]} : vector<32x128xf32> to vector<32x32xf32>
    %cst_60 = arith.constant dense<0.000000e+00> : vector<16x32xf32>
    %122 = tpu.matmul %120, %121, %cst_60 {dimension_numbers = #tpu.dot_dimension_numbers<[1], [1], [0], [0], [0, 0, 1, 0], [], []>} : vector<16x32xf32>, vector<32x32xf32>, vector<16x32xf32> -> vector<16x32xf32>
    %123 = tpu.concatenate %113, %116, %119, %122 in 0 : vector<16x32xf32>, vector<16x32xf32>, vector<16x32xf32>, vector<16x32xf32> -> vector<64x32xf32>
    %cst_61 = arith.constant 0.176776692 : f32
    %124 = vector.broadcast %cst_61 : f32 to vector<64x32xf32>
    %125 = arith.mulf %123, %124 : vector<64x32xf32>
    %cst_62 = arith.constant dense<0xFF800000> : vector<64xf32>
    %126 = vector.multi_reduction <maximumf>, %125, %cst_62 [1] : vector<64x32xf32> to vector<64xf32>
    %127 = vector.shape_cast %126 : vector<64xf32> to vector<64x1xf32>
    %128 = vector.broadcast %127 : vector<64x1xf32> to vector<64x32xf32>
    %129 = arith.subf %125, %128 : vector<64x32xf32>
    %130 = math.exp %129 : vector<64x32xf32>
    %cst_63 = arith.constant dense<0.000000e+00> : vector<64xf32>
    %131 = vector.multi_reduction <add>, %130, %cst_63 [1] : vector<64x32xf32> to vector<64xf32>
    %132 = vector.shape_cast %131 : vector<64xf32> to vector<64x1xf32>
    %133 = vector.broadcast %132 : vector<64x1xf32> to vector<64x32xf32>
    %134 = arith.divf %130, %133 : vector<64x32xf32>
    %135 = vector.extract_strided_slice %134 {offsets = [0, 0], sizes = [16, 32], strides = [1, 1]} : vector<64x32xf32> to vector<16x32xf32>
    %136 = vector.extract_strided_slice %110 {offsets = [0, 0], sizes = [32, 32], strides = [1, 1]} : vector<32x128xf32> to vector<32x32xf32>
    %cst_64 = arith.constant dense<0.000000e+00> : vector<16x32xf32>
    %137 = tpu.matmul %135, %136, %cst_64 {dimension_numbers = #tpu.dot_dimension_numbers<[1], [0], [0], [1], [0, 0, 1, 1], [], []>} : vector<16x32xf32>, vector<32x32xf32>, vector<16x32xf32> -> vector<16x32xf32>
    %138 = vector.extract_strided_slice %134 {offsets = [16, 0], sizes = [16, 32], strides = [1, 1]} : vector<64x32xf32> to vector<16x32xf32>
    %139 = vector.extract_strided_slice %110 {offsets = [0, 32], sizes = [32, 32], strides = [1, 1]} : vector<32x128xf32> to vector<32x32xf32>
    %cst_65 = arith.constant dense<0.000000e+00> : vector<16x32xf32>
    %140 = tpu.matmul %138, %139, %cst_65 {dimension_numbers = #tpu.dot_dimension_numbers<[1], [0], [0], [1], [0, 0, 1, 1], [], []>} : vector<16x32xf32>, vector<32x32xf32>, vector<16x32xf32> -> vector<16x32xf32>
    %141 = vector.extract_strided_slice %134 {offsets = [32, 0], sizes = [16, 32], strides = [1, 1]} : vector<64x32xf32> to vector<16x32xf32>
    %142 = vector.extract_strided_slice %110 {offsets = [0, 64], sizes = [32, 32], strides = [1, 1]} : vector<32x128xf32> to vector<32x32xf32>
    %cst_66 = arith.constant dense<0.000000e+00> : vector<16x32xf32>
    %143 = tpu.matmul %141, %142, %cst_66 {dimension_numbers = #tpu.dot_dimension_numbers<[1], [0], [0], [1], [0, 0, 1, 1], [], []>} : vector<16x32xf32>, vector<32x32xf32>, vector<16x32xf32> -> vector<16x32xf32>
    %144 = vector.extract_strided_slice %134 {offsets = [48, 0], sizes = [16, 32], strides = [1, 1]} : vector<64x32xf32> to vector<16x32xf32>
    %145 = vector.extract_strided_slice %110 {offsets = [0, 96], sizes = [32, 32], strides = [1, 1]} : vector<32x128xf32> to vector<32x32xf32>
    %cst_67 = arith.constant dense<0.000000e+00> : vector<16x32xf32>
    %146 = tpu.matmul %144, %145, %cst_67 {dimension_numbers = #tpu.dot_dimension_numbers<[1], [0], [0], [1], [0, 0, 1, 1], [], []>} : vector<16x32xf32>, vector<32x32xf32>, vector<16x32xf32> -> vector<16x32xf32>
    %147 = tpu.concatenate %137, %140, %143, %146 in 1 : vector<16x32xf32>, vector<16x32xf32>, vector<16x32xf32>, vector<16x32xf32> -> vector<16x128xf32>
    %c0_68 = arith.constant 0 : index
    %c0_69 = arith.constant 0 : index
    %148 = vector.load %arg15[%c0_68, %c0_69] : memref<128x128xf32, #tpu.memory_space<vmem>>, vector<128x128xf32>
    %cst_70 = arith.constant dense<0.000000e+00> : vector<16x128xf32>
    %149 = tpu.matmul %147, %148, %cst_70 {dimension_numbers = #tpu.dot_dimension_numbers<[1], [0], [0], [1], [0, 0, 1, 1], [], []>} : vector<16x128xf32>, vector<128x128xf32>, vector<16x128xf32> -> vector<16x128xf32>
    %150 = arith.addf %78, %149 : vector<16x128xf32>
    %c0_71 = arith.constant 0 : index
    %c0_72 = arith.constant 0 : index
    %151 = vector.load %arg16[%c0_71, %c0_72] : memref<1x128xf32, #tpu.memory_space<vmem>>, vector<1x128xf32>
    %c0_73 = arith.constant 0 : index
    %c0_74 = arith.constant 0 : index
    %152 = vector.load %arg17[%c0_73, %c0_74] : memref<1x128xf32, #tpu.memory_space<vmem>>, vector<1x128xf32>
    %cst_75 = arith.constant dense<0.000000e+00> : vector<16xf32>
    %153 = vector.multi_reduction <add>, %150, %cst_75 [1] : vector<16x128xf32> to vector<16xf32>
    %154 = vector.shape_cast %153 : vector<16xf32> to vector<16x1xf32>
    %cst_76 = arith.constant 1.280000e+02 : f32
    %155 = vector.broadcast %cst_76 : f32 to vector<16x1xf32>
    %156 = arith.divf %154, %155 : vector<16x1xf32>
    %157 = vector.broadcast %156 : vector<16x1xf32> to vector<16x128xf32>
    %158 = arith.subf %150, %157 : vector<16x128xf32>
    %159 = arith.mulf %158, %158 : vector<16x128xf32>
    %cst_77 = arith.constant dense<0.000000e+00> : vector<16xf32>
    %160 = vector.multi_reduction <add>, %159, %cst_77 [1] : vector<16x128xf32> to vector<16xf32>
    %161 = vector.shape_cast %160 : vector<16xf32> to vector<16x1xf32>
    %cst_78 = arith.constant 1.280000e+02 : f32
    %162 = vector.broadcast %cst_78 : f32 to vector<16x1xf32>
    %163 = arith.divf %161, %162 : vector<16x1xf32>
    %164 = vector.broadcast %156 : vector<16x1xf32> to vector<16x128xf32>
    %165 = arith.subf %150, %164 : vector<16x128xf32>
    %cst_79 = arith.constant 9.99999974E-6 : f32
    %166 = vector.broadcast %cst_79 : f32 to vector<16x1xf32>
    %167 = arith.addf %163, %166 : vector<16x1xf32>
    %168 = math.rsqrt %167 : vector<16x1xf32>
    %169 = vector.broadcast %168 : vector<16x1xf32> to vector<16x128xf32>
    %170 = arith.mulf %165, %169 : vector<16x128xf32>
    %171 = vector.broadcast %151 : vector<1x128xf32> to vector<16x128xf32>
    %172 = arith.mulf %170, %171 : vector<16x128xf32>
    %173 = vector.broadcast %152 : vector<1x128xf32> to vector<16x128xf32>
    %174 = arith.addf %172, %173 : vector<16x128xf32>
    %c0_80 = arith.constant 0 : index
    %c0_81 = arith.constant 0 : index
    %175 = vector.load %arg18[%c0_80, %c0_81] : memref<128x256xf32, #tpu.memory_space<vmem>>, vector<128x256xf32>
    %cst_82 = arith.constant dense<0.000000e+00> : vector<16x256xf32>
    %176 = tpu.matmul %174, %175, %cst_82 {dimension_numbers = #tpu.dot_dimension_numbers<[1], [0], [0], [1], [0, 0, 1, 1], [], []>} : vector<16x128xf32>, vector<128x256xf32>, vector<16x256xf32> -> vector<16x256xf32>
    %c0_83 = arith.constant 0 : index
    %c0_84 = arith.constant 0 : index
    %177 = vector.load %arg19[%c0_83, %c0_84] : memref<1x256xf32, #tpu.memory_space<vmem>>, vector<1x256xf32>
    %178 = vector.broadcast %177 : vector<1x256xf32> to vector<16x256xf32>
    %179 = arith.addf %176, %178 : vector<16x256xf32>
    %cst_85 = arith.constant 0.000000e+00 : f32
    %180 = vector.broadcast %cst_85 : f32 to vector<16x256xf32>
    %181 = arith.maximumf %179, %180 : vector<16x256xf32>
    %c0_86 = arith.constant 0 : index
    %c0_87 = arith.constant 0 : index
    %182 = vector.load %arg20[%c0_86, %c0_87] : memref<256x128xf32, #tpu.memory_space<vmem>>, vector<256x128xf32>
    %cst_88 = arith.constant dense<0.000000e+00> : vector<16x128xf32>
    %183 = tpu.matmul %181, %182, %cst_88 {dimension_numbers = #tpu.dot_dimension_numbers<[1], [0], [0], [1], [0, 0, 1, 1], [], []>} : vector<16x256xf32>, vector<256x128xf32>, vector<16x128xf32> -> vector<16x128xf32>
    %184 = arith.addf %150, %183 : vector<16x128xf32>
    %c0_89 = arith.constant 0 : index
    %c0_90 = arith.constant 0 : index
    %185 = vector.load %arg21[%c0_89, %c0_90] : memref<1x128xf32, #tpu.memory_space<vmem>>, vector<1x128xf32>
    %186 = vector.broadcast %185 : vector<1x128xf32> to vector<16x128xf32>
    %187 = arith.addf %184, %186 : vector<16x128xf32>
    %c0_91 = arith.constant 0 : index
    %c0_92 = arith.constant 0 : index
    %c0_93 = arith.constant 0 : index
    %188 = vector.load %arg22[%c0_91, %c0_92, %c0_93] : memref<1x16x128xf32, #tpu.memory_space<vmem>>, vector<1x16x128xf32>
    %189 = vector.shape_cast %188 : vector<1x16x128xf32> to vector<16x128xf32>
    %190 = vector.shape_cast %187 : vector<16x128xf32> to vector<1x16x128xf32>
    tpu.vector_store %arg22[%c0_91, %c0_92, %c0_93], %190 {strides = array<i32>} : memref<1x16x128xf32, #tpu.memory_space<vmem>>, vector<1x16x128xf32>,
    return
  }
  func.func @transform_0(%arg0: i32) -> (i32, i32, i32) {
    %c0_i32 = arith.constant 0 : i32
    %c0_i32_0 = arith.constant 0 : i32
    %c0_i32_1 = arith.constant 0 : i32
    return %arg0, %c0_i32, %c0_i32_0 : i32, i32, i32
  }
  func.func @transform_1(%arg0: i32) -> (i32, i32, i32) {
    %c0_i32 = arith.constant 0 : i32
    %c0_i32_0 = arith.constant 0 : i32
    %c0_i32_1 = arith.constant 0 : i32
    return %arg0, %c0_i32, %c0_i32_0 : i32, i32, i32
  }
  func.func @transform_2(%arg0: i32) -> (i32, i32, i32) {
    %c0_i32 = arith.constant 0 : i32
    %c0_i32_0 = arith.constant 0 : i32
    %c0_i32_1 = arith.constant 0 : i32
    return %arg0, %c0_i32, %c0_i32_0 : i32, i32, i32
  }
  func.func @transform_3(%arg0: i32) -> (i32, i32, i32) {
    %c0_i32 = arith.constant 0 : i32
    %c0_i32_0 = arith.constant 0 : i32
    %c0_i32_1 = arith.constant 0 : i32
    return %arg0, %c0_i32, %c0_i32_0 : i32, i32, i32
  }
  func.func @transform_4(%arg0: i32) -> (i32, i32) {
    %c0_i32 = arith.constant 0 : i32
    %c0_i32_0 = arith.constant 0 : i32
    %c0_i32_1 = arith.constant 0 : i32
    return %c0_i32, %c0_i32_0 : i32, i32
  }
  func.func @transform_5(%arg0: i32) -> (i32, i32) {
    %c0_i32 = arith.constant 0 : i32
    %c0_i32_0 = arith.constant 0 : i32
    %c0_i32_1 = arith.constant 0 : i32
    return %c0_i32, %c0_i32_0 : i32, i32
  }
  func.func @transform_6(%arg0: i32) -> (i32, i32) {
    %c0_i32 = arith.constant 0 : i32
    %c0_i32_0 = arith.constant 0 : i32
    %c0_i32_1 = arith.constant 0 : i32
    return %c0_i32, %c0_i32_0 : i32, i32
  }
  func.func @transform_7(%arg0: i32) -> (i32, i32) {
    %c0_i32 = arith.constant 0 : i32
    %c0_i32_0 = arith.constant 0 : i32
    %c0_i32_1 = arith.constant 0 : i32
    return %c0_i32, %c0_i32_0 : i32, i32
  }
  func.func @transform_8(%arg0: i32) -> (i32, i32) {
    %c0_i32 = arith.constant 0 : i32
    %c0_i32_0 = arith.constant 0 : i32
    %c0_i32_1 = arith.constant 0 : i32
    return %c0_i32, %c0_i32_0 : i32, i32
  }
  func.func @transform_9(%arg0: i32) -> (i32, i32) {
    %c0_i32 = arith.constant 0 : i32
    %c0_i32_0 = arith.constant 0 : i32
    %c0_i32_1 = arith.constant 0 : i32
    return %c0_i32, %c0_i32_0 : i32, i32
  }
  func.func @transform_10(%arg0: i32) -> (i32, i32) {
    %c0_i32 = arith.constant 0 : i32
    %c0_i32_0 = arith.constant 0 : i32
    %c0_i32_1 = arith.constant 0 : i32
    return %c0_i32, %c0_i32_0 : i32, i32
  }
  func.func @transform_11(%arg0: i32) -> (i32, i32) {
    %c0_i32 = arith.constant 0 : i32
    %c0_i32_0 = arith.constant 0 : i32
    %c0_i32_1 = arith.constant 0 : i32
    return %c0_i32, %c0_i32_0 : i32, i32
  }
  func.func @transform_12(%arg0: i32) -> (i32, i32) {
    %c0_i32 = arith.constant 0 : i32
    %c0_i32_0 = arith.constant 0 : i32
    %c0_i32_1 = arith.constant 0 : i32
    return %c0_i32, %c0_i32_0 : i32, i32
  }
  func.func @transform_13(%arg0: i32) -> (i32, i32) {
    %c0_i32 = arith.constant 0 : i32
    %c0_i32_0 = arith.constant 0 : i32
    %c0_i32_1 = arith.constant 0 : i32
    return %c0_i32, %c0_i32_0 : i32, i32
  }
  func.func @transform_14(%arg0: i32) -> (i32, i32) {
    %c0_i32 = arith.constant 0 : i32
    %c0_i32_0 = arith.constant 0 : i32
    %c0_i32_1 = arith.constant 0 : i32
    return %c0_i32, %c0_i32_0 : i32, i32
  }
  func.func @transform_15(%arg0: i32) -> (i32, i32) {
    %c0_i32 = arith.constant 0 : i32
    %c0_i32_0 = arith.constant 0 : i32
    %c0_i32_1 = arith.constant 0 : i32
    return %c0_i32, %c0_i32_0 : i32, i32
  }
  func.func @transform_16(%arg0: i32) -> (i32, i32) {
    %c0_i32 = arith.constant 0 : i32
    %c0_i32_0 = arith.constant 0 : i32
    %c0_i32_1 = arith.constant 0 : i32
    return %c0_i32, %c0_i32_0 : i32, i32
  }
  func.func @transform_17(%arg0: i32) -> (i32, i32) {
    %c0_i32 = arith.constant 0 : i32
    %c0_i32_0 = arith.constant 0 : i32
    %c0_i32_1 = arith.constant 0 : i32
    return %c0_i32, %c0_i32_0 : i32, i32
  }
  func.func @transform_18(%arg0: i32) -> (i32, i32) {
    %c0_i32 = arith.constant 0 : i32
    %c0_i32_0 = arith.constant 0 : i32
    %c0_i32_1 = arith.constant 0 : i32
    return %c0_i32, %c0_i32_0 : i32, i32
  }
  func.func @transform_19(%arg0: i32) -> (i32, i32) {
    %c0_i32 = arith.constant 0 : i32
    %c0_i32_0 = arith.constant 0 : i32
    %c0_i32_1 = arith.constant 0 : i32
    return %c0_i32, %c0_i32_0 : i32, i32
  }
  func.func @transform_20(%arg0: i32) -> (i32, i32) {
    %c0_i32 = arith.constant 0 : i32
    %c0_i32_0 = arith.constant 0 : i32
    %c0_i32_1 = arith.constant 0 : i32
    return %c0_i32, %c0_i32_0 : i32, i32
  }
  func.func @transform_21(%arg0: i32) -> (i32, i32, i32) {
    %c0_i32 = arith.constant 0 : i32
    %c0_i32_0 = arith.constant 0 : i32
    %c0_i32_1 = arith.constant 0 : i32
    return %arg0, %c0_i32, %c0_i32_0 : i32, i32, i32
  }
}

</mosaic_0001>

<bundles_post_ra>
// kernel: transformer_decoder_layer.1
= control target key start
LH: loop header
LB: loop body
LE: loop exit
PB: predicated region body
PF: predicated region fallthrough
CT: control target
= control target key end

     0   :  { %s5666_s0 = inlined_call_operand.vmem [shape: f32[2,16,128], index: 0, kind: input, shape index: {}]   ;;  %s5667_s1 = inlined_call_operand.vmem [shape: f32[2,32,128], index: 1, kind: input, shape index: {}]   ;;  %s5668_s2 = inlined_call_operand.vmem [shape: f32[2,16,128], index: 2, kind: input, shape index: {}]   ;;  %s5669_s3 = inlined_call_operand.vmem [shape: f32[2,32,128], index: 3, kind: input, shape index: {}]   ;;  %s5670_s4 = inlined_call_operand.vmem [shape: f32[1,128], index: 4, kind: input, shape index: {}]   ;;  %s5671_s5 = inlined_call_operand.vmem [shape: f32[1,128], index: 5, kind: input, shape index: {}]   ;;  %s5672_s6 = inlined_call_operand.vmem [shape: f32[128,256], index: 6, kind: input, shape index: {}]   ;;  %s5673_s7 = inlined_call_operand.vmem [shape: f32[128,128], index: 7, kind: input, shape index: {}]   ;;  %s5674_s8 = inlined_call_operand.hbm [shape: f32[128,128], index: 8, kind: input, shape index: {}]   ;;  %s5675_s9 = inlined_call_operand.vmem [shape: f32[1,128], index: 9, kind: input, shape index: {}]   ;;  %s5676_s10 = inlined_call_operand.vmem [shape: f32[1,128], index: 10, kind: input, shape index: {}]   ;;  %s5677_s11 = inlined_call_operand.hbm [shape: f32[128,128], index: 11, kind: input, shape index: {}]   ;;  %s5678_s12 = inlined_call_operand.hbm [shape: f32[128,128], index: 12, kind: input, shape index: {}]   ;;  %s5679_s13 = inlined_call_operand.hbm [shape: f32[128,128], index: 13, kind: input, shape index: {}]   ;;  %s5680_s14 = inlined_call_operand.hbm [shape: f32[128,128], index: 14, kind: input, shape index: {}]   ;;  %s5681_s15 = inlined_call_operand.vmem [shape: f32[1,128], index: 15, kind: input, shape index: {}]   ;;  %s5682_s16 = inlined_call_operand.vmem [shape: f32[1,128], index: 16, kind: input, shape index: {}]   ;;  %s5683_s17 = inlined_call_operand.hbm [shape: f32[128,256], index: 17, kind: input, shape index: {}]   ;;  %s5684_s18 = inlined_call_operand.vmem [shape: f32[1,256], index: 18, kind: input, shape index: {}]   ;;  %s5685_s19 = inlined_call_operand.hbm [shape: f32[256,128], index: 19, kind: input, shape index: {}]   ;;  %s5686_s20 = inlined_call_operand.vmem [shape: f32[1,128], index: 20, kind: input, shape index: {}]   ;;  %s5687_s21 = inlined_call_operand.vmem [shape: f32[2,16,128], index: 21, kind: output, shape index: {}]  }
   0x1   :  { %5692 = sst [smem:[#allocation17_spill]] %s5666_s0 }
   0x2   :  { %5693 = sst [smem:[#allocation18_spill]] %s5667_s1 }
   0x3   :  { %5694 = sst [smem:[#allocation19_spill]] %s5668_s2 }
   0x4   :  { %5695 = sst [smem:[#allocation20_spill]] %s5669_s3 }
   0x5   :  { %5696 = sst [smem:[#allocation21_spill]] %s5670_s4 }
   0x6   :  { %5697 = sst [smem:[#allocation22_spill]] %s5671_s5 }
   0x7   :  { %26 = vsyncpa [#allocation3], 0 }
   0x8   :  { %27 = vsyncpa [#allocation5], 0 }
   0x9   :  { %28 = vsyncpa [#allocation8], 0 }
   0xa   :  { %29 = vsyncpa [#allocation11], 0  ;;  %s4971_s2 = smov 0  }
   0xb LB: > { %s4977_s25 = sadd.s32 4294967295, %s4844_s2   ;;  %p3760_p0 = scmp.ge.s32.totalorder %s4844_s2, 1  ;;  %s4844_s2 = sphi %s4971_s2, %s35_s2  }
   0xc   : > { %p527_p1 = scmp.lt.s32.totalorder %s4844_s2, 3  ;;  %p4497_p2 = scmp.eq.s32.totalorder %s4977_s25, 0 }
   0xd   : > { %s4846_s27 = smov [#allocation4]   ;;  %s4847_s28 = smov [#allocation7]  }
   0xe   : > { %p4982_p3 = pnand %p3760_p0, %p527_p1  ;;  %s570_s3 = sshll.u32 %s4846_s27, 4  ;;  %s571_s3 = int_to_ptr.vmem [resolvable:$true] %s570_s3 }
   0xf   : > { %s596_s29 = sshll.u32 %s4847_s28, 4  ;;  %s4848_s4 = smov [#allocation10]   ;;  %s4988_s29 = int_to_ptr.vmem [resolvable:$true] %s596_s29 }
  0x10   : > { %p4475_p4 = pneg %p4982_p3  ;;  %s628_s30 = sshll.u32 %s4848_s4, 4  ;;  %s4996_s30 = int_to_ptr.vmem [resolvable:$true] %s628_s30 }
  0x11   : > { %s4651_s22 = scalar_lea.vmem %s571_s3, 2048  ;;  %p4659_p10 = scmp.lt.s32.totalorder %s571_s3, %s571_s3 }
  0x12   : > { %p4992_p5 = pnand %p4497_p2, %p4475_p4  ;;  %p4652_p7 = scmp.ne.s32.totalorder %s571_s3, %s4651_s22 }
  0x13   : > { %p4660_p11 = scmp.lt.s32.totalorder %s4651_s22, %s4651_s22 }
  0x14   : > { %p5000_p6 = pneg %p4992_p5 }
  0x15   : > { %p4661_p12 = por %p4660_p11, %p4659_p10 }
  0x16   : > { %p4654_p8 = pnand %p4652_p7, %p5000_p6 }
  0x18   : > { %p4655_p9 = pneg %p4654_p8 }
  0x1a   : > { %p4662_p13 = pnand %p4661_p12, %p4655_p9 }
  0x1c   : > { %4665 = shalt.err (!%p4662_p13)
}
  0x1d   : > { %s5688_s23 = smov 128   ;;  %s5690_s1 = smov 8  }
  0x1e   : > { %4481 = dma.hbm_to_vmem [thread:$0]  (!%p4992_p5), %s5677_s11, 2048, %s571_s3, [#allocation5], %s5688_s23, %s5688_s23, %s5690_s1  }
  0x1f   : > { %s4677_s28 = scalar_lea.vmem %s4988_s29, 2048  ;;  %p4685_p7 = scmp.lt.s32.totalorder %s4988_s29, %s4988_s29 }
  0x20   : > { %p4678_p0 = scmp.ne.s32.totalorder %s4988_s29, %s4677_s28  ;;  %p4686_p8 = scmp.lt.s32.totalorder %s4677_s28, %s4677_s28 }
  0x22   : > { %p4680_p1 = pnand %p4678_p0, %p5000_p6  ;;  %p4687_p9 = por %p4686_p8, %p4685_p7 }
  0x24   : > { %p4681_p4 = pneg %p4680_p1 }
  0x26   : > { %p4688_p10 = pnand %p4687_p9, %p4681_p4 }
  0x28   : > { %4691 = shalt.err (!%p4688_p10)
}
  0x29   : > { %4487 = dma.hbm_to_vmem [thread:$0]  (!%p4992_p5), %s5679_s13, 2048, %s4988_s29, [#allocation8], %s5688_s23, %s5688_s23, %s5690_s1  }
  0x2a   : > { %s4703_s3 = scalar_lea.vmem %s4996_s30, 4096  ;;  %p4711_p0 = scmp.lt.s32.totalorder %s4996_s30, %s4996_s30 }
  0x2b   : > { %p4704_p11 = scmp.ne.s32.totalorder %s4996_s30, %s4703_s3  ;;  %p4712_p1 = scmp.lt.s32.totalorder %s4703_s3, %s4703_s3 }
  0x2d   : > { %p4706_p12 = pnand %p4704_p11, %p5000_p6  ;;  %p4713_p4 = por %p4712_p1, %p4711_p0 }
  0x2f   : > { %p4707_p13 = pneg %p4706_p12 }
  0x31   : > { %p4714_p7 = pnand %p4713_p4, %p4707_p13 }
  0x33   : > { %4717 = shalt.err (!%p4714_p7)
}
  0x34   : > { %s4851_s24 = smov 256   ;;  %s4852_s27 = smov 16  }
  0x35   : > { %4493 = dma.hbm_to_vmem [thread:$0]  (!%p4992_p5), %s5683_s17, 4096, %s4996_s30, [#allocation11], %s4851_s24, %s4851_s24, %s4852_s27  }
  0x36   : > { %s4853_s29 = smov [#allocation2]   ;;  %s4854_s23 = smov [#allocation6]  }
  0x37   : > { %s551_s22 = sshll.u32 %s4853_s29, 4  ;;  %s583_s1 = sshll.u32 %s4854_s23, 4  ;;  %s552_s22 = int_to_ptr.vmem [resolvable:$true] %s551_s22  ;;  %s584_s1 = int_to_ptr.vmem [resolvable:$true] %s583_s1 }
  0x38   : > { %s4729_s3 = scalar_lea.vmem %s552_s22, 2048  ;;  %p4737_p11 = scmp.lt.s32.totalorder %s552_s22, %s552_s22 }
  0x39   : > { %p4730_p8 = scmp.ne.s32.totalorder %s552_s22, %s4729_s3  ;;  %p4738_p12 = scmp.lt.s32.totalorder %s4729_s3, %s4729_s3 }
  0x3b   : > { %p4732_p9 = pnand %p4730_p8, %p5000_p6  ;;  %p4739_p13 = por %p4738_p12, %p4737_p11 }
  0x3d   : > { %p4733_p10 = pneg %p4732_p9 }
  0x3f   : > { %p4740_p0 = pnand %p4739_p13, %p4733_p10 }
  0x41   : > { %4743 = shalt.err (!%p4740_p0)
}
  0x42   : > { %s5701_s28 = smov 8   ;;  %s5702_s30 = smov 128  }
  0x43   : > { %4478 = dma.hbm_to_vmem [thread:$0]  (!%p4992_p5), %s5674_s8, 2048, %s552_s22, [#allocation3], %s5702_s30, %s5702_s30, %s5701_s28  }
  0x44   : > { %s4755_s23 = scalar_lea.vmem %s584_s1, 2048  ;;  %p4763_p8 = scmp.lt.s32.totalorder %s584_s1, %s584_s1 }
  0x45   : > { %p4756_p1 = scmp.ne.s32.totalorder %s584_s1, %s4755_s23  ;;  %p4764_p9 = scmp.lt.s32.totalorder %s4755_s23, %s4755_s23 }
  0x47   : > { %p4758_p4 = pnand %p4756_p1, %p5000_p6  ;;  %p4765_p11 = por %p4764_p9, %p4763_p8 }
  0x49   : > { %p4759_p7 = pneg %p4758_p4 }
  0x4b   : > { %p4766_p10 = pnand %p4765_p11, %p4759_p7 }
  0x4d   : > { %4769 = shalt.err (!%p4766_p10)
}
  0x4e   : > { %4484 = dma.hbm_to_vmem [thread:$0]  (!%p4992_p5), %s5678_s12, 2048, %s584_s1, [#allocation5], %s5702_s30, %s5702_s30, %s5701_s28  }
  0x4f   : > { %s4855_s22 = smov [#allocation9]   ;;  %s4856_s24 = smov [#allocation12]  }
  0x50   : > { %s609_s3 = sshll.u32 %s4855_s22, 4  ;;  %s644_s27 = sshll.u32 %s4856_s24, 4  ;;  %s610_s3 = int_to_ptr.vmem [resolvable:$true] %s609_s3  ;;  %s645_s27 = int_to_ptr.vmem [resolvable:$true] %s644_s27 }
  0x51   : > { %s4781_s23 = scalar_lea.vmem %s610_s3, 2048  ;;  %p4789_p1 = scmp.lt.s32.totalorder %s610_s3, %s610_s3 }
  0x52   : > { %p4782_p12 = scmp.ne.s32.totalorder %s610_s3, %s4781_s23  ;;  %p4790_p4 = scmp.lt.s32.totalorder %s4781_s23, %s4781_s23 }
  0x54   : > { %p4784_p13 = pnand %p4782_p12, %p5000_p6  ;;  %p4791_p7 = por %p4790_p4, %p4789_p1 }
  0x56   : > { %p4785_p0 = pneg %p4784_p13 }
  0x58   : > { %p4792_p8 = pnand %p4791_p7, %p4785_p0 }
  0x5a   : > { %4795 = shalt.err (!%p4792_p8)
}
  0x5b   : > { %4490 = dma.hbm_to_vmem [thread:$0]  (!%p4992_p5), %s5680_s14, 2048, %s610_s3, [#allocation8], %s5702_s30, %s5702_s30, %s5701_s28  }
  0x5c   : > { %s4807_s29 = scalar_lea.vmem %s645_s27, 4096  ;;  %p4815_p12 = scmp.lt.s32.totalorder %s645_s27, %s645_s27 }
  0x5d   : > { %p4808_p9 = scmp.ne.s32.totalorder %s645_s27, %s4807_s29  ;;  %p4816_p13 = scmp.lt.s32.totalorder %s4807_s29, %s4807_s29 }
  0x5f   : > { %p4810_p11 = pnand %p4808_p9, %p5000_p6  ;;  %p4817_p1 = por %p4816_p13, %p4815_p12 }
  0x61   : > { %p4811_p10 = pneg %p4810_p11 }
  0x63   : > { %p4818_p0 = pnand %p4817_p1, %p4811_p10 }
  0x65   : > { %4821 = shalt.err (!%p4818_p0)
}
  0x66   : > { %4496 = dma.hbm_to_vmem [thread:$0]  (!%p4992_p5), %s5685_s19, 4096, %s645_s27, [#allocation11], %s5702_s30, %s5702_s30, %s5701_s28  }
  0x67   : > { %695 = sbr.rel (%p4982_p3) target bundleno = 4210 (0x1072), region = 104 }
  0x6c   : > { %4827 = dma.done.wait (%p4497_p2), [#allocation3], 2048  }
  0x6d   : > { %4829 = vsyncadd (%p4497_p2), [#allocation3], 4294965248 }
  0x6e   : > { %4831 = dma.done.wait (%p4497_p2), [#allocation5], 4096  }
  0x6f   : > { %4833 = vsyncadd (%p4497_p2), [#allocation5], 4294963200 }
  0x70   : > { %4835 = dma.done.wait (%p4497_p2), [#allocation8], 4096  }
  0x71   : > { %4837 = vsyncadd (%p4497_p2), [#allocation8], 4294963200 }
  0x72   : > { %4839 = dma.done.wait (%p4497_p2), [#allocation11], 8192  }
  0x73   : > { %4841 = vsyncadd (%p4497_p2), [#allocation11], 4294959104  ;;  %p794_p3 = scmp.lt.s32.totalorder %s4977_s25, 1  ;;  %s5703_s28 = sld [smem:[#allocation17_spill]]  ;;  %v905_v2 = vld [vmem:[%s5672_s6 + $0xf8] sm:$0xff]  ;;  %v904_v3 = vld [vmem:[%s5672_s6 + $0xf0] sm:$0xff] }
  0x74   : > { %v903_v4 = vld [vmem:[%s5672_s6 + $0xe8] sm:$0xff]  ;;  %906 = vmatprep.subr.mxu0 %v905_v2  ;;  %v998_v5 = vld [vmem:[%s5673_s7 + $0x78] sm:$0xff]  ;;  %v902_v6 = vld [vmem:[%s5672_s6 + $0xe0] sm:$0xff]  ;;  %v4857_v57 = vmov 0.0   ;;  %s5704_s23 = sld [smem:[#allocation21_spill]]  ;;  %vm1074_vm0 = vcmask 261120  }
  0x75   : > { %s5710_s25 = smov (!%p794_p3, %s4977_s25), 1  ;;  %907 = vmatpush1.msra.mxu0 %v904_v3  ;;  %4087 = vmatprep.subr.mxu1 %v998_v5  ;;  %v901_v7 = vld [vmem:[%s5672_s6 + $0xd8] sm:$0xff]  ;;  %v997_v8 = vld [vmem:[%s5673_s7 + $0x70] sm:$0xff]  ;;  %v899_v18 = vld [vmem:[%s5672_s6 + $0xc8] sm:$0xff]  ;;  %s5705_s29 = sld [smem:[#allocation19_spill]]  ;;  %vm1443_vm1 = vcmask 130048  }
  0x76   : > { %s5104_s26 = sshll.u32 %s5710_s25, 4  ;;  %908 = vmatprep.subr.mxu0 %v903_v4  ;;  %4088 = vmatpush3.msra.mxu1 %v998_v5  ;;  %v900_v9 = vld [vmem:[%s5672_s6 + $0xd0] sm:$0xff]  ;;  %v996_v19 = vld [vmem:[%s5673_s7 + $0x68] sm:$0xff]  ;;  %v898_v20 = vld [vmem:[%s5672_s6 + $0xc0] sm:$0xff]  ;;  %s5706_s5 = sld [smem:[#allocation22_spill]]  ;;  %vm1902_vm2 = vcmask 523264  }
  0x77   : > { %909 = vmatpush1.msra.mxu0 %v902_v6  ;;  %4089 = vmatprep.subr.mxu1 %v997_v8  ;;  %v897_v21 = vld [vmem:[%s5672_s6 + $0xb8] sm:$0xff]  ;;  %v995_v22 = vld [vmem:[%s5673_s7 + $0x60] sm:$0xff]  ;;  %v896_v23 = vld [vmem:[%s5672_s6 + $0xb0] sm:$0xff]  ;;  %s4860_s3 = smov 32   ;;  %vm1905_vm3 = vcmask 785408   ;;  %s3853_s27 = sshll.u32 %s5710_s25, 5 }
  0x78   : > { %910 = vmatprep.subr.mxu0 %v901_v7  ;;  %4090 = vmatpush3.msra.mxu1 %v997_v8  ;;  %v895_v24 = vld [vmem:[%s5672_s6 + $0xa8] sm:$0xff]  ;;  %v994_v25 = vld [vmem:[%s5673_s7 + $0x58] sm:$0xff]  ;;  %v894_v26 = vld [vmem:[%s5672_s6 + $0xa0] sm:$0xff]  ;;  %s5707_s4 = sld [smem:[#allocation18_spill]] }
  0x79   : > { %s798_s30 = scalar_lea.vmem %s5703_s28, %s5104_s26  ;;  %911 = vmatpush1.msra.mxu0 %v900_v9  ;;  %4091 = vmatprep.subr.mxu1 %v996_v19  ;;  %v893_v27 = vld [vmem:[%s5672_s6 + $0x98] sm:$0xff]  ;;  %v993_v28 = vld [vmem:[%s5673_s7 + $0x50] sm:$0xff]  ;;  %v891_v30 = vld [vmem:[%s5672_s6 + $0x88] sm:$0xff]  ;;  %s4858_s28 = smov 96  }
  0x7a   : > { %v5110_v0 = vld [vmem:[%s798_s30] sm:$0xff]  ;;  %v5113_v1 = vld [vmem:[%s798_s30 + $0x8] sm:$0xff]  ;;  %912 = vmatprep.subr.mxu0 %v899_v18  ;;  %4092 = vmatpush3.msra.mxu1 %v996_v19  ;;  %v892_v29 = vld [vmem:[%s5672_s6 + $0x90] sm:$0xff]  ;;  %s4859_s30 = smov 64   ;;  %s5708_s0 = sld [smem:[#allocation20_spill]] }
  0x7b   : > { %833 = vadd.xlane.f32.xlu0 %v5110_v0  ;;  %913 = vmatpush1.msra.mxu0 %v898_v20  ;;  %v992_v31 = vld [vmem:[%s5673_s7 + $0x48] sm:$0xff]  ;;  %v890_v32 = vld [vmem:[%s5672_s6 + $0x80] sm:$0xff]  ;;  %v889_v33 = vld [vmem:[%s5672_s6 + $0x78] sm:$0xff]  ;;  %s808_s22 = scalar_lea.vmem %s5705_s29, %s5104_s26 }
  0x7c   : > { %914 = vmatprep.subr.mxu0 %v897_v21  ;;  %4093 = vmatprep.subr.mxu1 %v995_v22  ;;  %v991_v34 = vld [vmem:[%s5673_s7 + $0x40] sm:$0xff]  ;;  %v888_v35 = vld [vmem:[%s5672_s6 + $0x70] sm:$0xff]  ;;  %v887_v36 = vld [vmem:[%s5672_s6 + $0x68] sm:$0xff] }
  0x7d   : > { %915 = vmatpush1.msra.mxu0 %v896_v23  ;;  %4094 = vmatpush3.msra.mxu1 %v995_v22  ;;  %v990_v37 = vld [vmem:[%s5673_s7 + $0x38] sm:$0xff]  ;;  %v886_v38 = vld [vmem:[%s5672_s6 + $0x60] sm:$0xff]  ;;  %v989_v40 = vld [vmem:[%s5673_s7 + $0x30] sm:$0xff] }
  0x7e   : > { %916 = vmatprep.subr.mxu0 %v895_v24  ;;  %4095 = vmatprep.subr.mxu1 %v994_v25  ;;  %v885_v39 = vld [vmem:[%s5672_s6 + $0x58] sm:$0xff]  ;;  %v884_v41 = vld [vmem:[%s5672_s6 + $0x50] sm:$0xff]  ;;  %v883_v42 = vld [vmem:[%s5672_s6 + $0x48] sm:$0xff]  ;;  %s5392_s29 = scalar_lea.vmem %s5707_s4, %s3853_s27 }
  0x7f   : > { %835 = vadd.xlane.f32.xlu0 %v5113_v1  ;;  %917 = vmatpush1.msra.mxu0 %v894_v26  ;;  %v988_v43 = vld [vmem:[%s5673_s7 + $0x28] sm:$0xff]  ;;  %v882_v44 = vld [vmem:[%s5672_s6 + $0x40] sm:$0xff]  ;;  %v881_v45 = vld [vmem:[%s5672_s6 + $0x38] sm:$0xff] }
  0x80   : > { %4096 = vmatpush3.msra.mxu1 %v994_v25  ;;  %918 = vmatprep.subr.mxu0 %v893_v27  ;;  %v987_v46 = vld [vmem:[%s5673_s7 + $0x20] sm:$0xff]  ;;  %v880_v47 = vld [vmem:[%s5672_s6 + $0x30] sm:$0xff]  ;;  %v879_v48 = vld [vmem:[%s5672_s6 + $0x28] sm:$0xff] }
  0x81   : > { %4097 = vmatprep.subr.mxu1 %v993_v28  ;;  %919 = vmatpush1.msra.mxu0 %v892_v29  ;;  %v986_v49 = vld [vmem:[%s5673_s7 + $0x18] sm:$0xff]  ;;  %v878_v50 = vld [vmem:[%s5672_s6 + $0x20] sm:$0xff]  ;;  %v985_v52 = vld [vmem:[%s5673_s7 + $0x10] sm:$0xff] }
  0x82   : > { %4098 = vmatpush3.msra.mxu1 %v993_v28  ;;  %920 = vmatprep.subr.mxu0 %v891_v30  ;;  %v877_v51 = vld [vmem:[%s5672_s6 + $0x18] sm:$0xff]  ;;  %v876_v53 = vld [vmem:[%s5672_s6 + $0x10] sm:$0xff]  ;;  %v875_v54 = vld [vmem:[%s5672_s6 + $0x8] sm:$0xff] }
  0x83   : > { %4099 = vmatprep.subr.mxu1 %v992_v31  ;;  %921 = vmatpush1.msra.mxu0 %v890_v32  ;;  %v984_v55 = vld [vmem:[%s5673_s7 + $0x8] sm:$0xff]  ;;  %v874_v56 = vld [vmem:[%s5672_s6] sm:$0xff] }
  0x84   : > { %4100 = vmatpush3.msra.mxu1 %v992_v31  ;;  %922 = vmatprep.subr.mxu0 %v889_v33  ;;  %v983_v58 = vld [vmem:[%s5673_s7] sm:$0xff] }
  0x85   : > { %4101 = vmatprep.subr.mxu1 %v991_v34  ;;  %923 = vmatpush1.msra.mxu0 %v888_v35  ;;  %v3787_v4 = vld [vmem:[%s5704_s23] ss:$0 sm:$0xff] }
  0x86   : > { %4102 = vmatpush3.msra.mxu1 %v991_v34  ;;  %924 = vmatprep.subr.mxu0 %v887_v36  ;;  %v3788_v6 = vld [vmem:[%s5706_s5] ss:$0 sm:$0xff]  ;;  %s5397_s5 = scalar_lea.vmem %s5708_s0, %s3853_s27  ;;  %s818_s27 = scalar_lea.vmem %s5687_s21, %s5104_s26 }
  0x87   : > { %4103 = vmatprep.subr.mxu1 %v990_v37  ;;  %925 = vmatpush1.msra.mxu0 %v886_v38  ;;  %v5282_v9 = vld [vmem:[%s808_s22] sm:$0xff] }
  0x88   : > { %4104 = vmatpush3.msra.mxu1 %v990_v37  ;;  %926 = vmatprep.subr.mxu0 %v885_v39 }
  0x89   : > { %4105 = vmatprep.subr.mxu1 %v989_v40  ;;  %927 = vmatpush1.msra.mxu0 %v884_v41 }
  0x8a   : > { %4106 = vmatpush3.msra.mxu1 %v989_v40  ;;  %928 = vmatprep.subr.mxu0 %v883_v42 }
  0x8b   : > { %4107 = vmatprep.subr.mxu1 %v988_v43  ;;  %929 = vmatpush1.msra.mxu0 %v882_v44 }
  0x8c   : > { %4108 = vmatpush3.msra.mxu1 %v988_v43  ;;  %930 = vmatprep.subr.mxu0 %v881_v45 }
  0x8d   : > { %4109 = vmatprep.subr.mxu1 %v987_v46  ;;  %931 = vmatpush1.msra.mxu0 %v880_v47 }
  0x8e   : > { %4110 = vmatpush3.msra.mxu1 %v987_v46  ;;  %932 = vmatprep.subr.mxu0 %v879_v48 }
  0x8f   : > { %4111 = vmatprep.subr.mxu1 %v986_v49  ;;  %933 = vmatpush1.msra.mxu0 %v878_v50 }
  0x90   : > { %4112 = vmatpush3.msra.mxu1 %v986_v49  ;;  %934 = vmatprep.subr.mxu0 %v877_v51 }
  0x91   : > { %4113 = vmatprep.subr.mxu1 %v985_v52  ;;  %935 = vmatpush1.msra.mxu0 %v876_v53 }
  0x92   : > { %4114 = vmatpush3.msra.mxu1 %v985_v52  ;;  %936 = vmatprep.subr.mxu0 %v875_v54 }
  0x93   : > { %4115 = vmatprep.subr.mxu1 %v984_v55  ;;  %937 = vmatpush1.msra.mxu0 %v874_v56 }
  0x94   : > { %970 = vmatprep.mubr.f32.mxu0 %v4857_v57  ;;  %4116 = vmatpush3.msra.mxu1 %v984_v55 }
  0x95   : > { %4117 = vmatprep.subr.mxu1 %v983_v58 }
  0x96   : > { %4118 = vmatpush3.msra.mxu1 %v983_v58 }
 0x104   : > { %v834_v10 = vpop.xlane.xlu0 %833 }
 0x105   : > { %v838_v11 = vmul.f32 0.0078125, %v834_v10 }
 0x107   : > { %v5141_v12 = vsub.f32 %v5110_v0, %v838_v11 }
 0x108   : > { %v836_v13 = vpop.xlane.xlu0 %835 }
 0x109   : > { %v839_v14 = vmul.f32 0.0078125, %v836_v13  ;;  %v842_v15 = vmul.f32 %v5141_v12, %v5141_v12 }
 0x10b   : > { %v5146_v16 = vsub.f32 %v5113_v1, %v839_v14  ;;  %844 = vadd.xlane.f32.xlu1 %v842_v15  ;;  %v5286_v15 = vld [vmem:[%s808_s22 + $0x8] sm:$0xff] }
 0x10d   : > { %v843_v17 = vmul.f32 %v5146_v16, %v5146_v16 }
 0x10f   : > { %846 = vadd.xlane.f32.xlu1 %v843_v17 }
 0x194   : > { %v845_v59 = vpop.xlane.xlu1 %844 }
 0x195   : > { %v848_v60 = vmul.f32 0.0078125, %v845_v59 }
 0x197   : > { %v850_v61 = vadd.f32 1e-05, %v848_v60 }
 0x198   : > { %v847_v62 = vpop.xlane.xlu1 %846 }
 0x199   : > { %4564 = vrsqrt.f32 %v850_v61  ;;  %v849_v63 = vmul.f32 0.0078125, %v847_v62 }
 0x19b   : > { %v851_v2 = vadd.f32 1e-05, %v849_v63 }
 0x19d   : > { %4566 = vrsqrt.f32 %v851_v2 }
 0x1a6   : > { %v4565_v3 = vpop.eup %4564 }
 0x1a7   : > { %v854_v5 = vmul.f32 %v4565_v3, %v5141_v12 }
 0x1a9   : > { %v862_v7 = vmul.f32 %v3787_v4, %v854_v5 }
 0x1aa   : > { %v4567_v8 = vpop.eup %4566 }
 0x1ab   : > { %v855_v10 = vmul.f32 %v4567_v8, %v5146_v16  ;;  %v870_v11 = vadd.f32 %v3788_v6, %v862_v7 }
 0x1ad   : > { %v863_v13 = vmul.f32 %v3787_v4, %v855_v10  ;;  %v872_v14 = vadd.f32 %v870_v11, %v5282_v9  ;;  %4119 = vmatprep.mubr.f32.mxu1 %v870_v11 }
 0x1af   : > { %v871_v17 = vadd.f32 %v3788_v6, %v863_v13  ;;  %971 = vmatmul.mubr.f32.vlgmr.msra.gmra.mxu0 %v872_v14 }
 0x1b0   : > { %976 = vmatprep.mubr.f32.mxu0 %v4857_v57 }
 0x1b1   : > { %4120 = vmatmul.mubr.f32.vlgmr.msra.gmra.mxu1 %v871_v17  ;;  %v873_v12 = vadd.f32 %v871_v17, %v5286_v15 }
 0x1b3   : > { %977 = vmatmul.mubr.f32.gmra.mxu0 %v873_v12 }
 0x26f   : > { %v972_v18 = vpop.f32.mrf.mxu0 }
 0x270   : > { %1162 = vrot.lane.b32.xlu1 %v972_v18, %s4858_s28  ;;  %4126 = vmatprep.mubr.msk.f32.mxu0 %vm1074_vm0, %v972_v18 }
 0x271   : > { %v974_v16 = vpop.f32.mrf.mxu0  ;;  %v4121_v29 = vpop.f32.mrf.mxu1 }
 0x273   : > { %v978_v19 = vpop.f32.mrf.mxu0  ;;  %v5324_v32 = vpop.f32.mrf.mxu1 }
 0x274   : > { %1166 = vrot.lane.b32.xlu1 %v974_v16, %s4858_s28 }
 0x275   : > { %v980_v20 = vpop.f32.mrf.mxu0 }
 0x276   : > { %1168 = vrot.lane.b32.xlu0 %v980_v20, %s4858_s28  ;;  %4122 = vmatprep.subr.msk.mxu0 %vm1074_vm0, %v980_v20 }
 0x277   : > { %4123 = vmatpush3.xpose.msk.msra.mxu0 %vm1074_vm0, %v980_v20 }
 0x278   : > { %1164 = vrot.lane.b32.xlu1 %v978_v19, %s4858_s28  ;;  %4124 = vmatprep.subr.msk.mxu0 %vm1074_vm0, %v974_v16 }
 0x27a   : > { %1257 = vrot.lane.b32.xlu0 %v974_v16, %s4859_s30 }
 0x27b   : > { %4125 = vmatpush3.xpose.msk.msra.mxu0 %vm1074_vm0, %v974_v16 }
 0x27c   : > { %1259 = vrot.lane.b32.xlu1 %v980_v20, %s4859_s30 }
 0x27e   : > { %1350 = vrot.lane.b32.xlu0 %v980_v20, %s4860_s3  ;;  %4127 = vmatmul.mubr.msk.f32.vlgmr.msra.gmra.mxu0 %vm1074_vm0, %v978_v19 }
 0x280   : > { %1348 = vrot.lane.b32.xlu1 %v974_v16, %s4860_s3 }
 0x282   : > { %1253 = vrot.lane.b32.xlu0 %v972_v18, %s4859_s30 }
 0x284   : > { %1255 = vrot.lane.b32.xlu1 %v978_v19, %s4859_s30 }
 0x286   : > { %1344 = vrot.lane.b32.xlu0 %v972_v18, %s4860_s3 }
 0x288   : > { %1346 = vrot.lane.b32.xlu1 %v978_v19, %s4860_s3 }
 0x2e2   : > { %v1163_v21 = vpop.permute.xlu1 %1162 }
 0x2e3   : > { %4133 = vmatprep.mubr.msk.f32.mxu1 %vm1074_vm0, %v1163_v21 }
 0x2e6   : > { %v1167_v22 = vpop.permute.xlu1 %1166 }
 0x2e8   : > { %v1169_v23 = vpop.permute.xlu0 %1168 }
 0x2e9   : > { %4129 = vmatprep.subr.msk.mxu1 %vm1074_vm0, %v1169_v23 }
 0x2ea   : > { %4130 = vmatpush3.xpose.msk.msra.mxu1 %vm1074_vm0, %v1169_v23  ;;  %v1165_v24 = vpop.permute.xlu1 %1164 }
 0x2eb   : > { %4131 = vmatprep.subr.msk.mxu1 %vm1074_vm0, %v1167_v22 }
 0x2ec   : > { %v1258_v25 = vpop.permute.xlu0 %1257 }
 0x2ee   : > { %4132 = vmatpush3.xpose.msk.msra.mxu1 %vm1074_vm0, %v1167_v22  ;;  %v1260_v26 = vpop.permute.xlu1 %1259 }
 0x2ef   : > { %4136 = vmatprep.subr.msk.mxu0 %vm1074_vm0, %v1260_v26 }
 0x2f0   : > { %v1351_v27 = vpop.permute.xlu0 %1350  ;;  %4137 = vmatpush3.xpose.msk.msra.mxu0 %vm1074_vm0, %v1260_v26 }
 0x2f1   : > { %4134 = vmatmul.mubr.msk.f32.vlgmr.msra.gmra.mxu1 %vm1074_vm0, %v1165_v24  ;;  %4138 = vmatprep.subr.msk.mxu0 %vm1074_vm0, %v1258_v25 }
 0x2f2   : > { %4143 = vmatprep.subr.msk.mxu1 %vm1074_vm0, %v1351_v27  ;;  %v1349_v28 = vpop.permute.xlu1 %1348 }
 0x2f3   : > { %4144 = vmatpush3.xpose.msk.msra.mxu1 %vm1074_vm0, %v1351_v27 }
 0x2f4   : > { %4145 = vmatprep.subr.msk.mxu1 %vm1074_vm0, %v1349_v28  ;;  %v1254_v30 = vpop.permute.xlu0 %1253  ;;  %4139 = vmatpush3.xpose.msk.msra.mxu0 %vm1074_vm0, %v1258_v25 }
 0x2f5   : > { %4140 = vmatprep.mubr.msk.f32.mxu0 %vm1074_vm0, %v1254_v30  ;;  %4150 = vmatprep.subr.mxu0 %v4121_v29 }
 0x2f6   : > { %v1256_v31 = vpop.permute.xlu1 %1255 }
 0x2f7   : > { %4146 = vmatpush3.xpose.msk.msra.mxu1 %vm1074_vm0, %v1349_v28  ;;  %4141 = vmatmul.mubr.msk.f32.vlgmr.msra.gmra.mxu0 %vm1074_vm0, %v1256_v31 }
 0x2f8   : > { %v1345_v33 = vpop.permute.xlu0 %1344  ;;  %4151 = vmatpush3.msra.mxu0 %v4121_v29 }
 0x2f9   : > { %4147 = vmatprep.mubr.msk.f32.mxu1 %vm1074_vm0, %v1345_v33  ;;  %4152 = vmatprep.subr.mxu0 %v5324_v32 }
 0x2fa   : > { %4153 = vmatpush3.msra.mxu0 %v5324_v32  ;;  %v1347_v34 = vpop.permute.xlu1 %1346 }
 0x2fb   : > { %4148 = vmatmul.mubr.msk.f32.vlgmr.msra.gmra.mxu1 %vm1074_vm0, %v1347_v34 }
 0x33e   : > { %v4128_v35 = vpop.f32.mrf.mxu0 }
 0x33f   : > { %v1436_v36 = vmul.f32 0.17677669, %v4128_v35 }
 0x340   : > { %v1153_v37 = vpop.f32.mrf.mxu0 }
 0x341   : > { %v1435_v38 = vmul.f32 0.17677669, %v1153_v37  ;;  %v1447_v39 = vsel %vm1443_vm1, %v1436_v36, -inf }
 0x342   : > { %1448 = vmax.xlane.f32.xlu1 %v1447_v39 }
 0x343   : > { %v1444_v40 = vsel %vm1443_vm1, %v1435_v38, -inf }
 0x344   : > { %1445 = vmax.xlane.f32.xlu0 %v1444_v40 }
 0x3b1   : > { %v4135_v41 = vpop.f32.mrf.mxu1 }
 0x3b2   : > { %v1438_v42 = vmul.f32 0.17677669, %v4135_v41 }
 0x3b3   : > { %v1244_v43 = vpop.f32.mrf.mxu1 }
 0x3b4   : > { %v1437_v44 = vmul.f32 0.17677669, %v1244_v43  ;;  %v1453_v45 = vsel %vm1443_vm1, %v1438_v42, -inf }
 0x3b5   : > { %1454 = vmax.xlane.f32.xlu0 %v1453_v45 }
 0x3b6   : > { %v1450_v48 = vsel %vm1443_vm1, %v1437_v44, -inf }
 0x3b7   : > { %v4142_v46 = vpop.f32.mrf.mxu0 }
 0x3b8   : > { %v1440_v47 = vmul.f32 0.17677669, %v4142_v46 }
 0x3b9   : > { %1451 = vmax.xlane.f32.xlu0 %v1450_v48  ;;  %v1335_v49 = vpop.f32.mrf.mxu0 }
 0x3ba   : > { %v1439_v50 = vmul.f32 0.17677669, %v1335_v49  ;;  %v1459_v51 = vsel %vm1443_vm1, %v1440_v47, -inf }
 0x3bb   : > { %1460 = vmax.xlane.f32.xlu1 %v1459_v51  ;;  %v4149_v52 = vpop.f32.mrf.mxu1 }
 0x3bc   : > { %v1442_v53 = vmul.f32 0.17677669, %v4149_v52  ;;  %v1456_v54 = vsel %vm1443_vm1, %v1439_v50, -inf }
 0x3bd   : > { %1457 = vmax.xlane.f32.xlu0 %v1456_v54  ;;  %v1426_v55 = vpop.f32.mrf.mxu1 }
 0x3be   : > { %v1441_v56 = vmul.f32 0.17677669, %v1426_v55  ;;  %v1465_v58 = vsel %vm1443_vm1, %v1442_v53, -inf }
 0x3bf   : > { %1466 = vmax.xlane.f32.xlu1 %v1465_v58 }
 0x3c0   : > { %v1462_v59 = vsel %vm1443_vm1, %v1441_v56, -inf }
 0x3c1   : > { %1463 = vmax.xlane.f32.xlu0 %v1462_v59 }
 0x3cb   : > { %v1449_v62 = vpop.xlane.xlu1 %1448 }
 0x3cc   : > { %v1469_v2 = vsub.f32 %v1436_v36, %v1449_v62 }
 0x3cd   : > { %v1446_v60 = vpop.xlane.xlu0 %1445 }
 0x3ce   : > { %v1468_v61 = vsub.f32 %v1435_v38, %v1446_v60  ;;  %v1478_v3 = vmul.f32 1.442695, %v1469_v2 }
 0x3d0   : > { %1615 = vrot.lane.b32.xlu1 %v5324_v32, %s4858_s28  ;;  %v1476_v63 = vmul.f32 1.442695, %v1468_v61 }
 0x3d2   : > { %4568 = vpow2.f32 %v1476_v63 }
 0x3d3   : > { %4570 = vpow2.f32 %v1478_v3 }
 0x3d4   : > { %1704 = vrot.lane.b32.xlu1 %v4121_v29, %s4859_s30 }
 0x3d7   : > { %1617 = vrot.lane.b32.xlu0 %v4121_v29, %s4858_s28 }
 0x3d8   : > { %1791 = vrot.lane.b32.xlu1 %v4121_v29, %s4860_s3 }
 0x3df   : > { %v5343_v4 = vpop.eup %4568 }
 0x3e0   : > { %v1492_v5 = vsel %vm1443_vm1, %v5343_v4, 0.0  ;;  %v5347_v6 = vpop.eup %4570 }
 0x3e1   : > { %v1495_v7 = vsel %vm1443_vm1, %v5347_v6, 0.0 }
 0x3f6   : > { %1493 = vadd.xlane.f32.xlu0 %v1492_v5 }
 0x3fc   : > { %1496 = vadd.xlane.f32.xlu1 %v1495_v7 }
 0x43e   : > { %v1455_v8 = vpop.xlane.xlu0 %1454 }
 0x43f   : > { %v1471_v10 = vsub.f32 %v1438_v42, %v1455_v8 }
 0x441   : > { %v1482_v11 = vmul.f32 1.442695, %v1471_v10  ;;  %v1923_v10 = vld [vmem:[#allocation2 + $0x78] sm:$0xff] }
 0x442   : > { %v1452_v13 = vpop.xlane.xlu0 %1451 }
 0x443   : > { %4572 = vpow2.f32 %v1482_v11  ;;  %v1470_v14 = vsub.f32 %v1437_v44, %v1452_v13  ;;  %v1922_v11 = vld [vmem:[#allocation2 + $0x70] sm:$0xff]  ;;  %v1921_v13 = vld [vmem:[#allocation2 + $0x68] sm:$0xff] }
 0x444   : > { %v1461_v17 = vpop.xlane.xlu1 %1460 }
 0x445   : > { %v1480_v12 = vmul.f32 1.442695, %v1470_v14  ;;  %v1473_v18 = vsub.f32 %v1440_v47, %v1461_v17  ;;  %v1920_v14 = vld [vmem:[#allocation2 + $0x60] sm:$0xff]  ;;  %v1919_v17 = vld [vmem:[#allocation2 + $0x58] sm:$0xff] }
 0x446   : > { %v1458_v16 = vpop.xlane.xlu0 %1457 }
 0x447   : > { %4574 = vpow2.f32 %v1480_v12  ;;  %v1486_v19 = vmul.f32 1.442695, %v1473_v18  ;;  %v1472_v20 = vsub.f32 %v1439_v50, %v1458_v16  ;;  %v1918_v12 = vld [vmem:[#allocation2 + $0x50] sm:$0xff]  ;;  %v1917_v18 = vld [vmem:[#allocation2 + $0x48] sm:$0xff]  ;;  %v1916_v16 = vld [vmem:[#allocation2 + $0x40] sm:$0xff] }
 0x448   : > { %v1467_v21 = vpop.xlane.xlu1 %1466 }
 0x449   : > { %4576 = vpow2.f32 %v1486_v19  ;;  %v1484_v22 = vmul.f32 1.442695, %v1472_v20  ;;  %v1475_v23 = vsub.f32 %v1442_v53, %v1467_v21  ;;  %v1915_v19 = vld [vmem:[#allocation2 + $0x38] sm:$0xff]  ;;  %v1914_v20 = vld [vmem:[#allocation2 + $0x30] sm:$0xff]  ;;  %v1913_v21 = vld [vmem:[#allocation2 + $0x28] sm:$0xff] }
 0x44a   : > { %v1464_v24 = vpop.xlane.xlu0 %1463 }
 0x44b   : > { %4578 = vpow2.f32 %v1484_v22  ;;  %v1490_v25 = vmul.f32 1.442695, %v1475_v23  ;;  %v1474_v26 = vsub.f32 %v1441_v56, %v1464_v24  ;;  %v1912_v22 = vld [vmem:[#allocation2 + $0x20] sm:$0xff]  ;;  %v1911_v23 = vld [vmem:[#allocation2 + $0x18] sm:$0xff]  ;;  %v1910_v24 = vld [vmem:[#allocation2 + $0x10] sm:$0xff] }
 0x44c   : > { %v1616_v27 = vpop.permute.xlu1 %1615 }
 0x44d   : > { %4580 = vpow2.f32 %v1490_v25  ;;  %v1488_v28 = vmul.f32 1.442695, %v1474_v26 }
 0x44e   : > { %v1618_v29 = vpop.permute.xlu0 %1617 }
 0x44f   : > { %4582 = vpow2.f32 %v1488_v28  ;;  %4157 = vmatprep.subr.mxu1 %v1618_v29  ;;  %v1908_v28 = vld [vmem:[#allocation2] sm:$0xff] }
 0x450   : > { %v4573_v30 = vpop.eup %4572  ;;  %4158 = vmatpush3.msra.mxu1 %v1618_v29  ;;  %v1705_v31 = vpop.permute.xlu1 %1704 }
 0x451   : > { %4159 = vmatprep.subr.mxu1 %v1616_v27  ;;  %4164 = vmatprep.subr.mxu0 %v1705_v31  ;;  %v1501_v33 = vsel %vm1443_vm1, %v4573_v30, 0.0 }
 0x452   : > { %1502 = vadd.xlane.f32.xlu1 %v1501_v33  ;;  %4160 = vmatpush3.msra.mxu1 %v1616_v27  ;;  %v1909_v27 = vld [vmem:[#allocation2 + $0x8] sm:$0xff] }
 0x454   : > { %v4575_v34 = vpop.eup %4574  ;;  %v1792_v35 = vpop.permute.xlu1 %1791 }
 0x455   : > { %4171 = vmatprep.subr.mxu1 %v1792_v35  ;;  %v1498_v36 = vsel %vm1443_vm1, %v4575_v34, 0.0 }
 0x456   : > { %v4577_v37 = vpop.eup %4576  ;;  %1499 = vadd.xlane.f32.xlu0 %v1498_v36 }
 0x457   : > { %v1507_v38 = vsel %vm1443_vm1, %v4577_v37, 0.0 }
 0x458   : > { %v4579_v39 = vpop.eup %4578  ;;  %1508 = vadd.xlane.f32.xlu1 %v1507_v38 }
 0x459   : > { %v1504_v40 = vsel %vm1443_vm1, %v4579_v39, 0.0 }
 0x45a   : > { %v4581_v41 = vpop.eup %4580  ;;  %1505 = vadd.xlane.f32.xlu0 %v1504_v40 }
 0x45b   : > { %v1513_v42 = vsel %vm1443_vm1, %v4581_v41, 0.0 }
 0x45c   : > { %v4583_v43 = vpop.eup %4582  ;;  %1514 = vadd.xlane.f32.xlu1 %v1513_v42 }
 0x45d   : > { %v1510_v44 = vsel %vm1443_vm1, %v4583_v43, 0.0 }
 0x45e   : > { %1511 = vadd.xlane.f32.xlu0 %v1510_v44 }
 0x46d   : > { %1789 = vrot.lane.b32.xlu1 %v5324_v32, %s4860_s3 }
 0x474   : > { %1702 = vrot.lane.b32.xlu0 %v5324_v32, %s4859_s30 }
 0x47f   : > { %v1494_v45 = vpop.xlane.xlu0 %1493 }
 0x480   : > { %4584 = vrcp.f32 %v1494_v45 }
 0x485   : > { %v1497_v46 = vpop.xlane.xlu1 %1496 }
 0x486   : > { %4586 = vrcp.f32 %v1497_v46 }
 0x48d   : > { %v4585_v47 = vpop.eup %4584 }
 0x48e   : > { %v1517_v48 = vmul.f32 %v4585_v47, %v5343_v4 }
 0x490   : > { %4154 = vmatprep.mubr.msk.f32.mxu0 %vm1443_vm1, %v1517_v48 }
 0x493   : > { %v4587_v49 = vpop.eup %4586 }
 0x494   : > { %v1519_v50 = vmul.f32 %v4587_v49, %v5347_v6 }
 0x496   : > { %4155 = vmatmul.mubr.msk.f32.vlgmr.msra.gmra.mxu0 %vm1443_vm1, %v1519_v50 }
 0x497   : > { %4165 = vmatpush3.msra.mxu0 %v1705_v31 }
 0x4db   : > { %v1503_v51 = vpop.xlane.xlu1 %1502 }
 0x4dc   : > { %4588 = vrcp.f32 %v1503_v51 }
 0x4df   : > { %v1500_v52 = vpop.xlane.xlu0 %1499 }
 0x4e0   : > { %4590 = vrcp.f32 %v1500_v52 }
 0x4e1   : > { %v1509_v32 = vpop.xlane.xlu1 %1508 }
 0x4e2   : > { %4592 = vrcp.f32 %v1509_v32 }
 0x4e3   : > { %v1506_v53 = vpop.xlane.xlu0 %1505 }
 0x4e4   : > { %4594 = vrcp.f32 %v1506_v53 }
 0x4e5   : > { %v1515_v54 = vpop.xlane.xlu1 %1514 }
 0x4e6   : > { %4596 = vrcp.f32 %v1515_v54 }
 0x4e7   : > { %v1512_v55 = vpop.xlane.xlu0 %1511 }
 0x4e8   : > { %4598 = vrcp.f32 %v1512_v55 }
 0x4e9   : > { %v4589_v58 = vpop.eup %4588  ;;  %v1790_v2 = vpop.permute.xlu1 %1789 }
 0x4ea   : > { %v1523_v61 = vmul.f32 %v4589_v58, %v4573_v30  ;;  %v2153_v58 = vld [vmem:[#allocation6 + $0x78] sm:$0xff] }
 0x4eb   : > { %v1703_v56 = vpop.permute.xlu0 %1702 }
 0x4ec   : > { %4166 = vmatprep.subr.mxu0 %v1703_v56 }
 0x4ed   : > { %v4591_v59 = vpop.eup %4590  ;;  %4167 = vmatpush3.msra.mxu0 %v1703_v56 }
 0x4ee   : > { %v1521_v60 = vmul.f32 %v4591_v59, %v4575_v34  ;;  %4178 = vmatprep.subr.mxu0 %v1923_v10  ;;  %v2152_v59 = vld [vmem:[#allocation6 + $0x70] sm:$0xff] }
 0x4ef   : > { %v4593_v62 = vpop.eup %4592 }
 0x4f0   : > { %4161 = vmatprep.mubr.msk.f32.mxu1 %vm1443_vm1, %v1521_v60  ;;  %v1527_v4 = vmul.f32 %v4593_v62, %v4577_v37  ;;  %v2151_v60 = vld [vmem:[#allocation6 + $0x68] sm:$0xff]  ;;  %v2149_v62 = vld [vmem:[#allocation6 + $0x58] sm:$0xff] }
 0x4f1   : > { %v4595_v63 = vpop.eup %4594  ;;  %4162 = vmatmul.mubr.msk.f32.vlgmr.msra.gmra.mxu1 %vm1443_vm1, %v1523_v61  ;;  %v827_v61 = vld [vmem:[%s5397_s5] sm:$0xff] }
 0x4f2   : > { %4172 = vmatpush3.msra.mxu1 %v1792_v35  ;;  %v1525_v3 = vmul.f32 %v4595_v63, %v4579_v39 }
 0x4f3   : > { %4173 = vmatprep.subr.mxu1 %v1790_v2  ;;  %v4597_v5 = vpop.eup %4596 }
 0x4f4   : > { %4174 = vmatpush3.msra.mxu1 %v1790_v2  ;;  %4168 = vmatprep.mubr.msk.f32.mxu0 %vm1443_vm1, %v1525_v3  ;;  %v1531_v8 = vmul.f32 %v4597_v5, %v4581_v41  ;;  %v2148_v2 = vld [vmem:[#allocation6 + $0x50] sm:$0xff]  ;;  %v2062_v3 = vld [vmem:[#allocation4 + $0x78] sm:$0xff]  ;;  %v2146_v5 = vld [vmem:[#allocation6 + $0x40] sm:$0xff] }
 0x4f5   : > { %v4599_v6 = vpop.eup %4598  ;;  %4169 = vmatmul.mubr.msk.f32.vlgmr.msra.gmra.mxu0 %vm1443_vm1, %v1527_v4  ;;  %4213 = vmatprep.subr.mxu1 %v2062_v3  ;;  %v2147_v4 = vld [vmem:[#allocation6 + $0x48] sm:$0xff] }
 0x4f6   : > { %v1529_v7 = vmul.f32 %v4599_v6, %v4583_v43  ;;  %4179 = vmatpush3.msra.mxu0 %v1923_v10  ;;  %v2145_v6 = vld [vmem:[#allocation6 + $0x38] sm:$0xff]  ;;  %v2142_v10 = vld [vmem:[#allocation6 + $0x20] sm:$0xff] }
 0x4f7   : > { %4180 = vmatprep.subr.mxu0 %v1922_v11 }
 0x4f8   : > { %4175 = vmatprep.mubr.msk.f32.mxu1 %vm1443_vm1, %v1529_v7  ;;  %4181 = vmatpush3.msra.mxu0 %v1922_v11  ;;  %v2144_v7 = vld [vmem:[#allocation6 + $0x30] sm:$0xff]  ;;  %v2141_v11 = vld [vmem:[#allocation6 + $0x18] sm:$0xff] }
 0x4f9   : > { %4176 = vmatmul.mubr.msk.f32.vlgmr.msra.gmra.mxu1 %vm1443_vm1, %v1531_v8  ;;  %4182 = vmatprep.subr.mxu0 %v1921_v13  ;;  %v2143_v8 = vld [vmem:[#allocation6 + $0x28] sm:$0xff] }
 0x4fa   : > { %4183 = vmatpush3.msra.mxu0 %v1921_v13  ;;  %4214 = vmatpush3.msra.mxu1 %v2062_v3  ;;  %v2140_v13 = vld [vmem:[#allocation6 + $0x10] sm:$0xff] }
 0x4fb   : > { %4184 = vmatprep.subr.mxu0 %v1920_v14 }
 0x4fc   : > { %4185 = vmatpush3.msra.mxu0 %v1920_v14  ;;  %v2139_v14 = vld [vmem:[#allocation6 + $0x8] sm:$0xff] }
 0x4fd   : > { %4186 = vmatprep.subr.mxu0 %v1919_v17 }
 0x4fe   : > { %4187 = vmatpush3.msra.mxu0 %v1919_v17  ;;  %v5405_v17 = vld [vmem:[%s5392_s29 + $0x8] sm:$0xff] }
 0x4ff   : > { %4188 = vmatprep.subr.mxu0 %v1918_v12 }
 0x500   : > { %4189 = vmatpush3.msra.mxu0 %v1918_v12  ;;  %v828_v12 = vld [vmem:[%s5397_s5 + $0x8] sm:$0xff] }
 0x501   : > { %4190 = vmatprep.subr.mxu0 %v1917_v18 }
 0x502   : > { %4191 = vmatpush3.msra.mxu0 %v1917_v18  ;;  %v5409_v18 = vld [vmem:[%s5392_s29 + $0x10] sm:$0xff] }
 0x503   : > { %4192 = vmatprep.subr.mxu0 %v1916_v16 }
 0x504   : > { %4193 = vmatpush3.msra.mxu0 %v1916_v16  ;;  %v829_v16 = vld [vmem:[%s5397_s5 + $0x10] sm:$0xff] }
 0x505   : > { %4194 = vmatprep.subr.mxu0 %v1915_v19 }
 0x506   : > { %4195 = vmatpush3.msra.mxu0 %v1915_v19  ;;  %v2138_v19 = vld [vmem:[#allocation6] sm:$0xff] }
 0x507   : > { %4196 = vmatprep.subr.mxu0 %v1914_v20 }
 0x508   : > { %4197 = vmatpush3.msra.mxu0 %v1914_v20  ;;  %v2044_v20 = vadd.f32 %v828_v12, %v5405_v17  ;;  %v2251_v12 = vld [vmem:[#allocation7 + $0x60] sm:$0xff] }
 0x509   : > { %4198 = vmatprep.subr.mxu0 %v1913_v21 }
 0x50a   : > { %4199 = vmatpush3.msra.mxu0 %v1913_v21  ;;  %v2045_v21 = vadd.f32 %v829_v16, %v5409_v18  ;;  %v2250_v16 = vld [vmem:[#allocation7 + $0x58] sm:$0xff] }
 0x50b   : > { %4200 = vmatprep.subr.mxu0 %v1912_v22 }
 0x50c   : > { %4201 = vmatpush3.msra.mxu0 %v1912_v22  ;;  %v5415_v22 = vld [vmem:[%s5392_s29 + $0x18] sm:$0xff] }
 0x50d   : > { %4202 = vmatprep.subr.mxu0 %v1911_v23 }
 0x50e   : > { %4203 = vmatpush3.msra.mxu0 %v1911_v23  ;;  %v830_v23 = vld [vmem:[%s5397_s5 + $0x18] sm:$0xff] }
 0x50f   : > { %4204 = vmatprep.subr.mxu0 %v1910_v24 }
 0x510   : > { %4205 = vmatpush3.msra.mxu0 %v1910_v24  ;;  %v2046_v24 = vadd.f32 %v830_v23, %v5415_v22  ;;  %v2243_v23 = vld [vmem:[#allocation7 + $0x20] sm:$0xff] }
 0x511   : > { %4206 = vmatprep.subr.mxu0 %v1909_v27 }
 0x512   : > { %4207 = vmatpush3.msra.mxu0 %v1909_v27 }
 0x513   : > { %4208 = vmatprep.subr.mxu0 %v1908_v28 }
 0x514   : > { %4209 = vmatpush3.msra.mxu0 %v1908_v28 }
 0x515   : > { %4248 = vmatprep.subr.mxu0 %v2153_v58 }
 0x556   : > { %v4156_v25 = vpop.f32.mrf.mxu0 }
 0x558   : > { %v1604_v29 = vpop.f32.mrf.mxu0 }
 0x5b1   : > { %v4163_v26 = vpop.f32.mrf.mxu1 }
 0x5b3   : > { %v1693_v30 = vpop.f32.mrf.mxu1 }
 0x5b4   : > { %v4534_v31 = vpack.i.bf16 %v4163_v26, %v1693_v30 }
 0x5b5   : > { %v4170_v33 = vpop.f32.mrf.mxu0 }
 0x5b6   : > { %4535 = vrot.lane.b32.xlu0 %v4534_v31, %s4860_s3 }
 0x5b7   : > { %v1780_v34 = vpop.f32.mrf.mxu0 }
 0x5b8   : > { %v4539_v35 = vpack.i.bf16 %v4170_v33, %v1780_v34  ;;  %v2061_v34 = vld [vmem:[#allocation4 + $0x70] sm:$0xff] }
 0x5b9   : > { %v4177_v36 = vpop.f32.mrf.mxu1  ;;  %4215 = vmatprep.subr.mxu1 %v2061_v34 }
 0x5ba   : > { %4540 = vrot.lane.b32.xlu1 %v4539_v35, %s4859_s30  ;;  %4216 = vmatpush3.msra.mxu1 %v2061_v34  ;;  %v2060_v35 = vld [vmem:[#allocation4 + $0x68] sm:$0xff] }
 0x5bb   : > { %v1867_v37 = vpop.f32.mrf.mxu1  ;;  %4217 = vmatprep.subr.mxu1 %v2060_v35 }
 0x5bc   : > { %v4544_v38 = vpack.i.bf16 %v4177_v36, %v1867_v37  ;;  %4218 = vmatpush3.msra.mxu1 %v2060_v35  ;;  %v2059_v36 = vld [vmem:[#allocation4 + $0x60] sm:$0xff]  ;;  %v2058_v37 = vld [vmem:[#allocation4 + $0x58] sm:$0xff] }
 0x5bd   : > { %4219 = vmatprep.subr.mxu1 %v2059_v36 }
 0x5be   : > { %4545 = vrot.lane.b32.xlu0 %v4544_v38, %s4858_s28  ;;  %4220 = vmatpush3.msra.mxu1 %v2059_v36  ;;  %v2057_v38 = vld [vmem:[#allocation4 + $0x50] sm:$0xff] }
 0x5bf   : > { %4221 = vmatprep.subr.mxu1 %v2058_v37 }
 0x5c0   : > { %4222 = vmatpush3.msra.mxu1 %v2058_v37 }
 0x5c1   : > { %4223 = vmatprep.subr.mxu1 %v2057_v38 }
 0x5c2   : > { %4224 = vmatpush3.msra.mxu1 %v2057_v38 }
 0x628   : > { %v4536_v39 = vpop.permute.xlu0 %4535 }
 0x629   : > { %v4538_v41 = vunpack.i.h.bf16 %v4536_v39  ;;  %v4537_v42 = vunpack.i.l.bf16 %v4536_v39  ;;  %v2056_v39 = vld [vmem:[#allocation4 + $0x48] sm:$0xff] }
 0x62a   : > { %4225 = vmatprep.subr.mxu1 %v2056_v39 }
 0x62b   : > { %v1901_v46 = vsel %vm1074_vm0, %v4156_v25, %v4538_v41  ;;  %v1900_v49 = vsel %vm1074_vm0, %v1604_v29, %v4537_v42  ;;  %4226 = vmatpush3.msra.mxu1 %v2056_v39  ;;  %v2054_v41 = vld [vmem:[#allocation4 + $0x38] sm:$0xff]  ;;  %v2053_v42 = vld [vmem:[#allocation4 + $0x30] sm:$0xff] }
 0x62c   : > { %v4541_v40 = vpop.permute.xlu1 %4540 }
 0x62d   : > { %v4543_v43 = vunpack.i.h.bf16 %v4541_v40  ;;  %v4542_v44 = vunpack.i.l.bf16 %v4541_v40  ;;  %v2055_v40 = vld [vmem:[#allocation4 + $0x40] sm:$0xff] }
 0x62e   : > { %4227 = vmatprep.subr.mxu1 %v2055_v40 }
 0x62f   : > { %v1903_v50 = vsel %vm1902_vm2, %v1900_v49, %v4542_v44  ;;  %v1904_v51 = vsel %vm1902_vm2, %v1901_v46, %v4543_v43  ;;  %4228 = vmatpush3.msra.mxu1 %v2055_v40  ;;  %v2052_v43 = vld [vmem:[#allocation4 + $0x28] sm:$0xff]  ;;  %v2051_v44 = vld [vmem:[#allocation4 + $0x20] sm:$0xff]  ;;  %v2049_v46 = vld [vmem:[#allocation4 + $0x10] sm:$0xff] }
 0x630   : > { %v4546_v45 = vpop.permute.xlu0 %4545  ;;  %4229 = vmatprep.subr.mxu1 %v2054_v41  ;;  %v2254_v49 = vld [vmem:[#allocation7 + $0x78] sm:$0xff] }
 0x631   : > { %v4548_v47 = vunpack.i.h.bf16 %v4546_v45  ;;  %v4547_v48 = vunpack.i.l.bf16 %v4546_v45  ;;  %4230 = vmatpush3.msra.mxu1 %v2054_v41  ;;  %v2050_v45 = vld [vmem:[#allocation4 + $0x18] sm:$0xff] }
 0x632   : > { %4231 = vmatprep.subr.mxu1 %v2053_v42 }
 0x633   : > { %v1906_v52 = vsel %vm1905_vm3, %v1903_v50, %v4547_v48  ;;  %v1907_v32 = vsel %vm1905_vm3, %v1904_v51, %v4548_v47  ;;  %4232 = vmatpush3.msra.mxu1 %v2053_v42  ;;  %v2048_v47 = vld [vmem:[#allocation4 + $0x8] sm:$0xff]  ;;  %v2047_v48 = vld [vmem:[#allocation4] sm:$0xff] }
 0x634   : > { %4210 = vmatprep.mubr.f32.mxu0 %v1906_v52  ;;  %4233 = vmatprep.subr.mxu1 %v2052_v43 }
 0x635   : > { %4211 = vmatmul.mubr.f32.vlgmr.msra.gmra.mxu0 %v1907_v32  ;;  %4234 = vmatpush3.msra.mxu1 %v2052_v43 }
 0x636   : > { %4249 = vmatpush3.msra.mxu0 %v2153_v58  ;;  %4235 = vmatprep.subr.mxu1 %v2051_v44 }
 0x637   : > { %4250 = vmatprep.subr.mxu0 %v2152_v59  ;;  %4236 = vmatpush3.msra.mxu1 %v2051_v44 }
 0x638   : > { %4251 = vmatpush3.msra.mxu0 %v2152_v59  ;;  %4237 = vmatprep.subr.mxu1 %v2050_v45 }
 0x639   : > { %4252 = vmatprep.subr.mxu0 %v2151_v60  ;;  %4238 = vmatpush3.msra.mxu1 %v2050_v45 }
 0x63a   : > { %4253 = vmatpush3.msra.mxu0 %v2151_v60  ;;  %4239 = vmatprep.subr.mxu1 %v2049_v46 }
 0x63b   : > { %4240 = vmatpush3.msra.mxu1 %v2049_v46 }
 0x63c   : > { %4241 = vmatprep.subr.mxu1 %v2048_v47 }
 0x63d   : > { %4242 = vmatpush3.msra.mxu1 %v2048_v47 }
 0x63e   : > { %4243 = vmatprep.subr.mxu1 %v2047_v48 }
 0x63f   : > { %4244 = vmatpush3.msra.mxu1 %v2047_v48 }
 0x640   : > { %4286 = vmatprep.subr.mxu1 %v2254_v49 }
 0x6f5   : > { %v4212_v53 = vpop.f32.mrf.mxu0 }
 0x6f6   : > { %v5381_v54 = vadd.f32 %v4212_v53, %v5113_v1  ;;  %v5400_v1 = vld [vmem:[%s5392_s29] sm:$0xff] }
 0x6f7   : > { %v1990_v55 = vpop.f32.mrf.mxu0  ;;  %v2043_v63 = vadd.f32 %v827_v61, %v5400_v1 }
 0x6f8   : > { %v5384_v56 = vadd.f32 %v1990_v55, %v5110_v0  ;;  %2005 = vadd.xlane.f32.xlu0 %v5381_v54  ;;  %v2150_v0 = vld [vmem:[#allocation6 + $0x60] sm:$0xff] }
 0x6f9   : > { %4254 = vmatprep.subr.mxu0 %v2150_v0  ;;  %4280 = vmatprep.mubr.f32.mxu0 %v2043_v63 }
 0x6fa   : > { %2003 = vadd.xlane.f32.xlu1 %v5384_v56  ;;  %4255 = vmatpush3.msra.mxu0 %v2150_v0 }
 0x6fb   : > { %4256 = vmatprep.subr.mxu0 %v2149_v62 }
 0x6fc   : > { %4257 = vmatpush3.msra.mxu0 %v2149_v62  ;;  %v3813_v62 = vld [vmem:[%s5675_s9] ss:$0 sm:$0xff] }
 0x6fd   : > { %4258 = vmatprep.subr.mxu0 %v2148_v2 }
 0x6fe   : > { %4259 = vmatpush3.msra.mxu0 %v2148_v2  ;;  %v3814_v2 = vld [vmem:[%s5676_s10] ss:$0 sm:$0xff] }
 0x6ff   : > { %4260 = vmatprep.subr.mxu0 %v2147_v4 }
 0x700   : > { %4261 = vmatpush3.msra.mxu0 %v2147_v4 }
 0x701   : > { %4262 = vmatprep.subr.mxu0 %v2146_v5 }
 0x702   : > { %4263 = vmatpush3.msra.mxu0 %v2146_v5 }
 0x703   : > { %4264 = vmatprep.subr.mxu0 %v2145_v6 }
 0x704   : > { %4265 = vmatpush3.msra.mxu0 %v2145_v6 }
 0x705   : > { %4266 = vmatprep.subr.mxu0 %v2144_v7 }
 0x706   : > { %4267 = vmatpush3.msra.mxu0 %v2144_v7 }
 0x707   : > { %4268 = vmatprep.subr.mxu0 %v2143_v8 }
 0x708   : > { %4269 = vmatpush3.msra.mxu0 %v2143_v8 }
 0x709   : > { %4270 = vmatprep.subr.mxu0 %v2142_v10 }
 0x70a   : > { %4271 = vmatpush3.msra.mxu0 %v2142_v10 }
 0x70b   : > { %4272 = vmatprep.subr.mxu0 %v2141_v11 }
 0x70c   : > { %4273 = vmatpush3.msra.mxu0 %v2141_v11 }
 0x70d   : > { %4274 = vmatprep.subr.mxu0 %v2140_v13 }
 0x70e   : > { %4275 = vmatpush3.msra.mxu0 %v2140_v13  ;;  %v2253_v13 = vld [vmem:[#allocation7 + $0x70] sm:$0xff] }
 0x70f   : > { %4276 = vmatprep.subr.mxu0 %v2139_v14 }
 0x710   : > { %4277 = vmatpush3.msra.mxu0 %v2139_v14  ;;  %v2252_v14 = vld [vmem:[#allocation7 + $0x68] sm:$0xff] }
 0x711   : > { %4278 = vmatprep.subr.mxu0 %v2138_v19 }
 0x712   : > { %4279 = vmatpush3.msra.mxu0 %v2138_v19  ;;  %v2249_v19 = vld [vmem:[#allocation7 + $0x50] sm:$0xff] }
 0x713   : > { %4281 = vmatmul.mubr.f32.vlgmr.msra.gmra.mxu0 %v2044_v20  ;;  %v2246_v20 = vld [vmem:[#allocation7 + $0x38] sm:$0xff] }
 0x714   : > { %4283 = vmatprep.mubr.f32.mxu0 %v2045_v21  ;;  %v2244_v21 = vld [vmem:[#allocation7 + $0x28] sm:$0xff] }
 0x717   : > { %4284 = vmatmul.mubr.f32.gmra.mxu0 %v2046_v24  ;;  %v2242_v24 = vld [vmem:[#allocation7 + $0x18] sm:$0xff] }
 0x781   : > { %v2006_v25 = vpop.xlane.xlu0 %2005 }
 0x782   : > { %v2008_v27 = vmul.f32 0.0078125, %v2006_v25  ;;  %v2241_v25 = vld [vmem:[#allocation7 + $0x10] sm:$0xff] }
 0x783   : > { %v2004_v26 = vpop.xlane.xlu1 %2003 }
 0x784   : > { %v2007_v28 = vmul.f32 0.0078125, %v2004_v26  ;;  %v5423_v30 = vsub.f32 %v5381_v54, %v2008_v27  ;;  %v2240_v26 = vld [vmem:[#allocation7 + $0x8] sm:$0xff]  ;;  %v2239_v27 = vld [vmem:[#allocation7] sm:$0xff] }
 0x786   : > { %v5420_v29 = vsub.f32 %v5384_v56, %v2007_v28  ;;  %v2012_v33 = vmul.f32 %v5423_v30, %v5423_v30 }
 0x788   : > { %v2011_v31 = vmul.f32 %v5420_v29, %v5420_v29 }
 0x78a   : > { %2013 = vadd.xlane.f32.xlu0 %v2011_v31 }
 0x78e   : > { %2015 = vadd.xlane.f32.xlu0 %v2012_v33 }
 0x7d3   : > { %v5429_v50 = vpop.f32.mrf.mxu0 }
 0x7d5   : > { %v5431_v51 = vpop.f32.mrf.mxu0 }
 0x7d7   : > { %v5433_v52 = vpop.f32.mrf.mxu0 }
 0x7d8   : > { %2443 = vrot.lane.b32.xlu1 %v5433_v52, %s4858_s28 }
 0x7d9   : > { %v5437_v32 = vpop.f32.mrf.mxu0 }
 0x7da   : > { %2441 = vrot.lane.b32.xlu0 %v5437_v32, %s4858_s28 }
 0x7dc   : > { %2439 = vrot.lane.b32.xlu1 %v5429_v50, %s4858_s28 }
 0x7de   : > { %2639 = vrot.lane.b32.xlu0 %v5437_v32, %s4860_s3 }
 0x7e0   : > { %2437 = vrot.lane.b32.xlu1 %v5431_v51, %s4858_s28 }
 0x7e4   : > { %2542 = vrot.lane.b32.xlu1 %v5433_v52, %s4859_s30 }
 0x7e8   : > { %2641 = vrot.lane.b32.xlu1 %v5433_v52, %s4860_s3 }
 0x7ec   : > { %2540 = vrot.lane.b32.xlu1 %v5437_v32, %s4859_s30 }
 0x7f0   : > { %2538 = vrot.lane.b32.xlu1 %v5429_v50, %s4859_s30 }
 0x7f4   : > { %2536 = vrot.lane.b32.xlu1 %v5431_v51, %s4859_s30 }
 0x813   : > { %v2014_v53 = vpop.xlane.xlu0 %2013 }
 0x814   : > { %v2017_v55 = vmul.f32 0.0078125, %v2014_v53 }
 0x816   : > { %v2019_v58 = vadd.f32 1e-05, %v2017_v55 }
 0x817   : > { %v2016_v59 = vpop.xlane.xlu0 %2015 }
 0x818   : > { %4600 = vrsqrt.f32 %v2019_v58  ;;  %v2018_v60 = vmul.f32 0.0078125, %v2016_v59 }
 0x81a   : > { %v2020_v0 = vadd.f32 1e-05, %v2018_v60 }
 0x81c   : > { %4602 = vrsqrt.f32 %v2020_v0 }
 0x825   : > { %v4601_v61 = vpop.eup %4600 }
 0x826   : > { %v2023_v63 = vmul.f32 %v4601_v61, %v5420_v29 }
 0x828   : > { %v2031_v3 = vmul.f32 %v3813_v62, %v2023_v63 }
 0x829   : > { %v4603_v4 = vpop.eup %4602 }
 0x82a   : > { %v2024_v5 = vmul.f32 %v4603_v4, %v5423_v30  ;;  %v2039_v6 = vadd.f32 %v3814_v2, %v2031_v3 }
 0x82c   : > { %v2032_v7 = vmul.f32 %v3813_v62, %v2024_v5  ;;  %v2041_v8 = vadd.f32 %v2039_v6, %v5282_v9  ;;  %v2248_v9 = vld [vmem:[#allocation7 + $0x48] sm:$0xff] }
 0x82e   : > { %v2040_v10 = vadd.f32 %v3814_v2, %v2032_v7  ;;  %4245 = vmatprep.mubr.f32.mxu1 %v2041_v8 }
 0x830   : > { %v2042_v11 = vadd.f32 %v2040_v10, %v5286_v15  ;;  %v2247_v15 = vld [vmem:[#allocation7 + $0x40] sm:$0xff] }
 0x832   : > { %4246 = vmatmul.mubr.f32.vlgmr.msra.gmra.mxu1 %v2042_v11 }
 0x833   : > { %4287 = vmatpush3.msra.mxu1 %v2254_v49  ;;  %4318 = vmatprep.mubr.f32.mxu1 %v5400_v1  ;;  %v2245_v1 = vld [vmem:[#allocation7 + $0x30] sm:$0xff] }
 0x834   : > { %4288 = vmatprep.subr.mxu1 %v2253_v13 }
 0x835   : > { %4289 = vmatpush3.msra.mxu1 %v2253_v13 }
 0x836   : > { %4290 = vmatprep.subr.mxu1 %v2252_v14 }
 0x837   : > { %4291 = vmatpush3.msra.mxu1 %v2252_v14 }
 0x838   : > { %4292 = vmatprep.subr.mxu1 %v2251_v12 }
 0x839   : > { %4293 = vmatpush3.msra.mxu1 %v2251_v12 }
 0x83a   : > { %4294 = vmatprep.subr.mxu1 %v2250_v16 }
 0x83b   : > { %4295 = vmatpush3.msra.mxu1 %v2250_v16 }
 0x83c   : > { %4296 = vmatprep.subr.mxu1 %v2249_v19 }
 0x83d   : > { %4297 = vmatpush3.msra.mxu1 %v2249_v19 }
 0x83e   : > { %4298 = vmatprep.subr.mxu1 %v2248_v9 }
 0x83f   : > { %4299 = vmatpush3.msra.mxu1 %v2248_v9 }
 0x840   : > { %4300 = vmatprep.subr.mxu1 %v2247_v15 }
 0x841   : > { %4301 = vmatpush3.msra.mxu1 %v2247_v15 }
 0x842   : > { %4302 = vmatprep.subr.mxu1 %v2246_v20 }
 0x843   : > { %4303 = vmatpush3.msra.mxu1 %v2246_v20 }
 0x844   : > { %4304 = vmatprep.subr.mxu1 %v2245_v1 }
 0x845   : > { %4305 = vmatpush3.msra.mxu1 %v2245_v1 }
 0x846   : > { %4306 = vmatprep.subr.mxu1 %v2244_v21 }
 0x847   : > { %4307 = vmatpush3.msra.mxu1 %v2244_v21 }
 0x848   : > { %4308 = vmatprep.subr.mxu1 %v2243_v23 }
 0x849   : > { %4309 = vmatpush3.msra.mxu1 %v2243_v23 }
 0x84a   : > { %4310 = vmatprep.subr.mxu1 %v2242_v24 }
 0x84b   : > { %4311 = vmatpush3.msra.mxu1 %v2242_v24 }
 0x84c   : > { %4312 = vmatprep.subr.mxu1 %v2241_v25  ;;  %v2442_v36 = vpop.permute.xlu0 %2441 }
 0x84d   : > { %4313 = vmatpush3.msra.mxu1 %v2241_v25 }
 0x84e   : > { %4314 = vmatprep.subr.mxu1 %v2240_v26 }
 0x84f   : > { %4315 = vmatpush3.msra.mxu1 %v2240_v26 }
 0x850   : > { %4316 = vmatprep.subr.mxu1 %v2239_v27  ;;  %v2640_v40 = vpop.permute.xlu0 %2639 }
 0x851   : > { %4317 = vmatpush3.msra.mxu1 %v2239_v27 }
 0x852   : > { %4324 = vmatprep.subr.msk.mxu1 %vm1074_vm0, %v5433_v52  ;;  %4319 = vmatmul.mubr.f32.vlgmr.msra.gmra.mxu1 %v5405_v17  ;;  %v2444_v17 = vpop.permute.xlu1 %2443 }
 0x853   : > { %4325 = vmatpush3.xpose.msk.msra.mxu1 %vm1074_vm0, %v5433_v52  ;;  %4321 = vmatprep.mubr.f32.mxu1 %v5409_v18 }
 0x854   : > { %4326 = vmatprep.subr.msk.mxu1 %vm1074_vm0, %v5437_v32 }
 0x856   : > { %4322 = vmatmul.mubr.f32.gmra.mxu1 %v5415_v22  ;;  %v2440_v18 = vpop.permute.xlu1 %2439 }
 0x857   : > { %4327 = vmatpush3.xpose.msk.msra.mxu1 %vm1074_vm0, %v5437_v32 }
 0x858   : > { %4328 = vmatprep.subr.msk.mxu1 %vm1074_vm0, %v5429_v50 }
 0x85a   : > { %v2438_v22 = vpop.permute.xlu1 %2437 }
 0x85b   : > { %4329 = vmatpush3.xpose.msk.msra.mxu1 %vm1074_vm0, %v5429_v50 }
 0x85c   : > { %4330 = vmatprep.subr.msk.mxu1 %vm1074_vm0, %v5431_v51 }
 0x85e   : > { %v2543_v28 = vpop.permute.xlu1 %2542 }
 0x85f   : > { %4331 = vmatpush3.xpose.msk.msra.mxu1 %vm1074_vm0, %v5431_v51  ;;  %4346 = vmatprep.subr.msk.mxu0 %vm1074_vm0, %v2543_v28 }
 0x860   : > { %4335 = vmatprep.subr.msk.mxu1 %vm1074_vm0, %v2444_v17  ;;  %4347 = vmatpush3.xpose.msk.msra.mxu0 %vm1074_vm0, %v2543_v28 }
 0x862   : > { %v2642_v29 = vpop.permute.xlu1 %2641 }
 0x866   : > { %v2541_v30 = vpop.permute.xlu1 %2540 }
 0x867   : > { %4348 = vmatprep.subr.msk.mxu0 %vm1074_vm0, %v2541_v30 }
 0x868   : > { %4349 = vmatpush3.xpose.msk.msra.mxu0 %vm1074_vm0, %v2541_v30 }
 0x86a   : > { %v2539_v31 = vpop.permute.xlu1 %2538 }
 0x86b   : > { %4350 = vmatprep.subr.msk.mxu0 %vm1074_vm0, %v2539_v31 }
 0x86c   : > { %4351 = vmatpush3.xpose.msk.msra.mxu0 %vm1074_vm0, %v2539_v31 }
 0x86e   : > { %v2537_v33 = vpop.permute.xlu1 %2536 }
 0x86f   : > { %4352 = vmatprep.subr.msk.mxu0 %vm1074_vm0, %v2537_v33 }
 0x870   : > { %4353 = vmatpush3.xpose.msk.msra.mxu0 %vm1074_vm0, %v2537_v33 }
 0x8f2   : > { %v4247_v34 = vpop.f32.mrf.mxu1 }
 0x8f3   : > { %2435 = vrot.lane.b32.xlu0 %v4247_v34, %s4858_s28 }
 0x8f4   : > { %v2129_v35 = vpop.f32.mrf.mxu1 }
 0x8f5   : > { %2532 = vrot.lane.b32.xlu1 %v2129_v35, %s4859_s30  ;;  %4332 = vmatprep.mubr.msk.f32.mxu1 %vm1074_vm0, %v2129_v35 }
 0x8f6   : > { %4333 = vmatmul.mubr.msk.f32.vlgmr.msra.gmra.mxu1 %vm1074_vm0, %v4247_v34 }
 0x8f7   : > { %2433 = vrot.lane.b32.xlu0 %v2129_v35, %s4858_s28  ;;  %4336 = vmatpush3.xpose.msk.msra.mxu1 %vm1074_vm0, %v2444_v17 }
 0x8f8   : > { %4337 = vmatprep.subr.msk.mxu1 %vm1074_vm0, %v2442_v36 }
 0x8f9   : > { %2631 = vrot.lane.b32.xlu1 %v2129_v35, %s4860_s3 }
 0x8fb   : > { %2637 = vrot.lane.b32.xlu0 %v5429_v50, %s4860_s3  ;;  %4338 = vmatpush3.xpose.msk.msra.mxu1 %vm1074_vm0, %v2442_v36 }
 0x8fc   : > { %4339 = vmatprep.subr.msk.mxu1 %vm1074_vm0, %v2440_v18 }
 0x8ff   : > { %2635 = vrot.lane.b32.xlu0 %v5431_v51, %s4860_s3  ;;  %4340 = vmatpush3.xpose.msk.msra.mxu1 %vm1074_vm0, %v2440_v18 }
 0x900   : > { %4341 = vmatprep.subr.msk.mxu1 %vm1074_vm0, %v2438_v22 }
 0x903   : > { %2534 = vrot.lane.b32.xlu0 %v4247_v34, %s4859_s30  ;;  %4342 = vmatpush3.xpose.msk.msra.mxu1 %vm1074_vm0, %v2438_v22 }
 0x904   : > { %4357 = vmatprep.subr.msk.mxu1 %vm1074_vm0, %v2642_v29 }
 0x907   : > { %2633 = vrot.lane.b32.xlu0 %v4247_v34, %s4860_s3 }
 0x912   : > { %v5516_v37 = vpop.f32.mrf.mxu1 }
 0x914   : > { %v5518_v38 = vpop.f32.mrf.mxu1 }
 0x916   : > { %v5520_v39 = vpop.f32.mrf.mxu1 }
 0x917   : > { %4368 = vmatprep.subr.mxu0 %v5520_v39 }
 0x918   : > { %v2331_v48 = vpop.f32.mrf.mxu1 }
 0x965   : > { %v2436_v41 = vpop.permute.xlu0 %2435 }
 0x967   : > { %v2533_v42 = vpop.permute.xlu1 %2532 }
 0x968   : > { %4354 = vmatprep.mubr.msk.f32.mxu0 %vm1074_vm0, %v2533_v42 }
 0x969   : > { %v2434_v43 = vpop.permute.xlu0 %2433 }
 0x96a   : > { %4343 = vmatprep.mubr.msk.f32.mxu1 %vm1074_vm0, %v2434_v43 }
 0x96b   : > { %4344 = vmatmul.mubr.msk.f32.vlgmr.msra.gmra.mxu1 %vm1074_vm0, %v2436_v41  ;;  %v2632_v44 = vpop.permute.xlu1 %2631 }
 0x96c   : > { %4358 = vmatpush3.xpose.msk.msra.mxu1 %vm1074_vm0, %v2642_v29  ;;  %4365 = vmatprep.mubr.msk.f32.mxu1 %vm1074_vm0, %v2632_v44 }
 0x96d   : > { %4359 = vmatprep.subr.msk.mxu1 %vm1074_vm0, %v2640_v40  ;;  %v2638_v45 = vpop.permute.xlu0 %2637 }
 0x970   : > { %4360 = vmatpush3.xpose.msk.msra.mxu1 %vm1074_vm0, %v2640_v40 }
 0x971   : > { %4361 = vmatprep.subr.msk.mxu1 %vm1074_vm0, %v2638_v45  ;;  %v2636_v46 = vpop.permute.xlu0 %2635 }
 0x974   : > { %4362 = vmatpush3.xpose.msk.msra.mxu1 %vm1074_vm0, %v2638_v45 }
 0x975   : > { %4363 = vmatprep.subr.msk.mxu1 %vm1074_vm0, %v2636_v46  ;;  %v2535_v47 = vpop.permute.xlu0 %2534 }
 0x976   : > { %4355 = vmatmul.mubr.msk.f32.vlgmr.msra.gmra.mxu0 %vm1074_vm0, %v2535_v47 }
 0x977   : > { %4369 = vmatpush3.msra.mxu0 %v5520_v39 }
 0x978   : > { %4364 = vmatpush3.xpose.msk.msra.mxu1 %vm1074_vm0, %v2636_v46  ;;  %4370 = vmatprep.subr.mxu0 %v2331_v48 }
 0x979   : > { %v2634_v49 = vpop.permute.xlu0 %2633  ;;  %4371 = vmatpush3.msra.mxu0 %v2331_v48 }
 0x97a   : > { %4372 = vmatprep.subr.mxu0 %v5516_v37 }
 0x97b   : > { %4366 = vmatmul.mubr.msk.f32.vlgmr.msra.gmra.mxu1 %vm1074_vm0, %v2634_v49  ;;  %4373 = vmatpush3.msra.mxu0 %v5516_v37 }
 0x97c   : > { %4374 = vmatprep.subr.mxu0 %v5518_v38 }
 0x97d   : > { %4375 = vmatpush3.msra.mxu0 %v5518_v38 }
 0x9b6   : > { %v4334_v50 = vpop.f32.mrf.mxu1 }
 0x9b7   : > { %v2731_v51 = vmul.f32 0.17677669, %v4334_v50 }
 0x9b8   : > { %v2424_v52 = vpop.f32.mrf.mxu1 }
 0x9b9   : > { %v2730_v32 = vmul.f32 0.17677669, %v2424_v52  ;;  %v2741_v53 = vsel %vm1074_vm0, %v2731_v51, -inf }
 0x9ba   : > { %2742 = vmax.xlane.f32.xlu0 %v2741_v53 }
 0x9bb   : > { %v2738_v55 = vsel %vm1074_vm0, %v2730_v32, -inf }
 0x9bc   : > { %2739 = vmax.xlane.f32.xlu1 %v2738_v55 }
 0xa2b   : > { %v4345_v58 = vpop.f32.mrf.mxu1 }
 0xa2c   : > { %v2733_v59 = vmul.f32 0.17677669, %v4345_v58 }
 0xa2d   : > { %v2523_v60 = vpop.f32.mrf.mxu1 }
 0xa2e   : > { %v2732_v0 = vmul.f32 0.17677669, %v2523_v60  ;;  %v2747_v61 = vsel %vm1074_vm0, %v2733_v59, -inf }
 0xa2f   : > { %2748 = vmax.xlane.f32.xlu0 %v2747_v61 }
 0xa30   : > { %v2744_v62 = vsel %vm1074_vm0, %v2732_v0, -inf }
 0xa33   : > { %2745 = vmax.xlane.f32.xlu0 %v2744_v62 }
 0xa36   : > { %v4356_v63 = vpop.f32.mrf.mxu0 }
 0xa37   : > { %v2735_v2 = vmul.f32 0.17677669, %v4356_v63 }
 0xa38   : > { %v2622_v3 = vpop.f32.mrf.mxu0 }
 0xa39   : > { %v2734_v4 = vmul.f32 0.17677669, %v2622_v3  ;;  %v2753_v5 = vsel %vm1074_vm0, %v2735_v2, -inf }
 0xa3a   : > { %2754 = vmax.xlane.f32.xlu0 %v2753_v5 }
 0xa3b   : > { %v4367_v6 = vpop.f32.mrf.mxu1  ;;  %v2750_v7 = vsel %vm1074_vm0, %v2734_v4, -inf }
 0xa3c   : > { %v2737_v8 = vmul.f32 0.17677669, %v4367_v6  ;;  %2751 = vmax.xlane.f32.xlu1 %v2750_v7 }
 0xa3d   : > { %v2721_v14 = vpop.f32.mrf.mxu1 }
 0xa3e   : > { %v2759_v10 = vsel %vm1074_vm0, %v2737_v8, -inf  ;;  %v5556_v16 = vmul.f32 0.17677669, %v2721_v14 }
 0xa3f   : > { %2760 = vmax.xlane.f32.xlu0 %v2759_v10 }
 0xa40   : > { %v2756_v19 = vsel %vm1074_vm0, %v5556_v16, -inf }
 0xa43   : > { %v2743_v11 = vpop.xlane.xlu0 %2742 }
 0xa44   : > { %v2763_v13 = vsub.f32 %v2731_v51, %v2743_v11 }
 0xa45   : > { %v2740_v20 = vpop.xlane.xlu1 %2739 }
 0xa46   : > { %v2772_v12 = vmul.f32 1.442695, %v2763_v13  ;;  %v2762_v1 = vsub.f32 %v2730_v32, %v2740_v20 }
 0xa48   : > { %4604 = vpow2.f32 %v2772_v12  ;;  %v2770_v21 = vmul.f32 1.442695, %v2762_v1 }
 0xa4a   : > { %4606 = vpow2.f32 %v2770_v21 }
 0xa4d   : > { %2917 = vrot.lane.b32.xlu1 %v5520_v39, %s4858_s28 }
 0xa55   : > { %2915 = vrot.lane.b32.xlu0 %v2331_v48, %s4858_s28  ;;  %v5560_v9 = vpop.eup %4604 }
 0xa56   : > { %v2789_v15 = vsel %vm1074_vm0, %v5560_v9, 0.0 }
 0xa57   : > { %v5573_v23 = vpop.eup %4606 }
 0xa58   : > { %v2786_v24 = vsel %vm1074_vm0, %v5573_v23, 0.0 }
 0xa59   : > { %3103 = vrot.lane.b32.xlu0 %v5520_v39, %s4860_s3 }
 0xa5d   : > { %3101 = vrot.lane.b32.xlu0 %v2331_v48, %s4860_s3 }
 0xa61   : > { %3099 = vrot.lane.b32.xlu0 %v5516_v37, %s4860_s3 }
 0xa71   : > { %2757 = vmax.xlane.f32.xlu1 %v2756_v19 }
 0xa80   : > { %2790 = vadd.xlane.f32.xlu0 %v2789_v15 }
 0xa82   : > { %2913 = vrot.lane.b32.xlu1 %v5516_v37, %s4858_s28 }
 0xa86   : > { %2911 = vrot.lane.b32.xlu1 %v5518_v38, %s4858_s28 }
 0xa8a   : > { %3010 = vrot.lane.b32.xlu1 %v5520_v39, %s4859_s30 }
 0xa8e   : > { %3008 = vrot.lane.b32.xlu1 %v2331_v48, %s4859_s30 }
 0xa92   : > { %3006 = vrot.lane.b32.xlu1 %v5516_v37, %s4859_s30 }
 0xab6   : > { %2787 = vadd.xlane.f32.xlu1 %v2786_v24 }
 0xab8   : > { %v2749_v25 = vpop.xlane.xlu0 %2748 }
 0xab9   : > { %v2765_v26 = vsub.f32 %v2733_v59, %v2749_v25 }
 0xabb   : > { %v2776_v27 = vmul.f32 1.442695, %v2765_v26 }
 0xabc   : > { %v2746_v17 = vpop.xlane.xlu0 %2745 }
 0xabd   : > { %4608 = vpow2.f32 %v2776_v27  ;;  %v2764_v18 = vsub.f32 %v2732_v0, %v2746_v17 }
 0xabf   : > { %v2774_v22 = vmul.f32 1.442695, %v2764_v18 }
 0xac1   : > { %4610 = vpow2.f32 %v2774_v22  ;;  %v3235_v22 = vld [vmem:[#allocation9 + $0x78] sm:$0xff] }
 0xac3   : > { %v2755_v28 = vpop.xlane.xlu0 %2754 }
 0xac4   : > { %v2767_v29 = vsub.f32 %v2735_v2, %v2755_v28  ;;  %v3234_v28 = vld [vmem:[#allocation9 + $0x70] sm:$0xff] }
 0xac5   : > { %v2752_v30 = vpop.xlane.xlu1 %2751 }
 0xac6   : > { %v2780_v31 = vmul.f32 1.442695, %v2767_v29  ;;  %v2766_v33 = vsub.f32 %v2734_v4, %v2752_v30  ;;  %v3233_v29 = vld [vmem:[#allocation9 + $0x68] sm:$0xff]  ;;  %v3232_v30 = vld [vmem:[#allocation9 + $0x60] sm:$0xff] }
 0xac8   : > { %4612 = vpow2.f32 %v2780_v31  ;;  %v2778_v34 = vmul.f32 1.442695, %v2766_v33  ;;  %v2761_v35 = vpop.xlane.xlu0 %2760  ;;  %v3231_v33 = vld [vmem:[#allocation9 + $0x58] sm:$0xff] }
 0xac9   : > { %v2769_v36 = vsub.f32 %v2737_v8, %v2761_v35  ;;  %v2918_v37 = vpop.permute.xlu1 %2917  ;;  %v3230_v35 = vld [vmem:[#allocation9 + $0x50] sm:$0xff] }
 0xaca   : > { %v5577_v39 = vpop.eup %4608  ;;  %4614 = vpow2.f32 %v2778_v34  ;;  %4379 = vmatprep.subr.mxu1 %v2918_v37 }
 0xacb   : > { %v2784_v40 = vmul.f32 1.442695, %v2769_v36  ;;  %4380 = vmatpush3.msra.mxu1 %v2918_v37  ;;  %v2795_v41 = vsel %vm1074_vm0, %v5577_v39, 0.0  ;;  %v3229_v37 = vld [vmem:[#allocation9 + $0x48] sm:$0xff] }
 0xacc   : > { %v2916_v42 = vpop.permute.xlu0 %2915  ;;  %2796 = vadd.xlane.f32.xlu0 %v2795_v41  ;;  %v3226_v41 = vld [vmem:[#allocation9 + $0x30] sm:$0xff] }
 0xacd   : > { %4616 = vpow2.f32 %v2784_v40  ;;  %4381 = vmatprep.subr.mxu1 %v2916_v42  ;;  %v3227_v40 = vld [vmem:[#allocation9 + $0x38] sm:$0xff] }
 0xace   : > { %v4611_v43 = vpop.eup %4610  ;;  %4382 = vmatpush3.msra.mxu1 %v2916_v42  ;;  %v3225_v42 = vld [vmem:[#allocation9 + $0x28] sm:$0xff] }
 0xacf   : > { %v2792_v44 = vsel %vm1074_vm0, %v4611_v43, 0.0 }
 0xad0   : > { %2793 = vadd.xlane.f32.xlu1 %v2792_v44  ;;  %v3104_v58 = vpop.permute.xlu0 %3103  ;;  %v3224_v44 = vld [vmem:[#allocation9 + $0x20] sm:$0xff] }
 0xad4   : > { %v3102_v61 = vpop.permute.xlu0 %3101 }
 0xad5   : > { %v5582_v45 = vpop.eup %4612 }
 0xad6   : > { %v2801_v46 = vsel %vm1074_vm0, %v5582_v45, 0.0 }
 0xad7   : > { %v5586_v47 = vpop.eup %4614  ;;  %2802 = vadd.xlane.f32.xlu0 %v2801_v46 }
 0xad8   : > { %v2798_v48 = vsel %vm1074_vm0, %v5586_v47, 0.0  ;;  %v3100_v63 = vpop.permute.xlu0 %3099 }
 0xad9   : > { %2799 = vadd.xlane.f32.xlu1 %v2798_v48 }
 0xada   : > { %v5590_v49 = vpop.eup %4616 }
 0xadb   : > { %v2807_v50 = vsel %vm1074_vm0, %v5590_v49, 0.0 }
 0xadc   : > { %2808 = vadd.xlane.f32.xlu0 %v2807_v50 }
 0xaf2   : > { %3097 = vrot.lane.b32.xlu0 %v5518_v38, %s4860_s3 }
 0xafa   : > { %v2758_v51 = vpop.xlane.xlu1 %2757 }
 0xafb   : > { %v2768_v52 = vsub.f32 %v5556_v16, %v2758_v51  ;;  %v3221_v51 = vld [vmem:[#allocation9 + $0x8] sm:$0xff] }
 0xafd   : > { %v2782_v32 = vmul.f32 1.442695, %v2768_v52  ;;  %v3220_v52 = vld [vmem:[#allocation9] sm:$0xff] }
 0xafe   : > { %v2914_v53 = vpop.permute.xlu1 %2913 }
 0xaff   : > { %4618 = vpow2.f32 %v2782_v32  ;;  %4383 = vmatprep.subr.mxu1 %v2914_v53 }
 0xb00   : > { %4384 = vmatpush3.msra.mxu1 %v2914_v53 }
 0xb02   : > { %v2912_v55 = vpop.permute.xlu1 %2911 }
 0xb03   : > { %4385 = vmatprep.subr.mxu1 %v2912_v55 }
 0xb04   : > { %4386 = vmatpush3.msra.mxu1 %v2912_v55 }
 0xb05   : > { %4401 = vmatprep.subr.mxu1 %v3104_v58 }
 0xb06   : > { %v3011_v59 = vpop.permute.xlu1 %3010 }
 0xb07   : > { %4390 = vmatprep.subr.mxu0 %v3011_v59 }
 0xb09   : > { %v2791_v3 = vpop.xlane.xlu0 %2790 }
 0xb0a   : > { %v3009_v62 = vpop.permute.xlu1 %3008  ;;  %4620 = vrcp.f32 %v2791_v3 }
 0xb0c   : > { %v4619_v60 = vpop.eup %4618 }
 0xb0d   : > { %v2804_v0 = vsel %vm1074_vm0, %v4619_v60, 0.0 }
 0xb0e   : > { %2805 = vadd.xlane.f32.xlu1 %v2804_v0  ;;  %v3007_v2 = vpop.permute.xlu1 %3006 }
 0xb17   : > { %v4621_v5 = vpop.eup %4620 }
 0xb18   : > { %v2813_v8 = vmul.f32 %v4621_v5, %v5560_v9 }
 0xb1f   : > { %3004 = vrot.lane.b32.xlu1 %v5518_v38, %s4859_s30 }
 0xb3f   : > { %v2788_v4 = vpop.xlane.xlu1 %2787 }
 0xb40   : > { %4622 = vrcp.f32 %v2788_v4 }
 0xb4d   : > { %v4623_v6 = vpop.eup %4622 }
 0xb4e   : > { %v2811_v7 = vmul.f32 %v4623_v6, %v5573_v23 }
 0xb50   : > { %4376 = vmatprep.mubr.msk.f32.mxu0 %vm1074_vm0, %v2811_v7 }
 0xb51   : > { %4377 = vmatmul.mubr.msk.f32.vlgmr.msra.gmra.mxu0 %vm1074_vm0, %v2813_v8 }
 0xb52   : > { %4391 = vmatpush3.msra.mxu0 %v3011_v59 }
 0xb53   : > { %4392 = vmatprep.subr.mxu0 %v3009_v62 }
 0xb54   : > { %4393 = vmatpush3.msra.mxu0 %v3009_v62 }
 0xb55   : > { %4394 = vmatprep.subr.mxu0 %v3007_v2  ;;  %v2797_v38 = vpop.xlane.xlu0 %2796 }
 0xb56   : > { %4395 = vmatpush3.msra.mxu0 %v3007_v2  ;;  %4624 = vrcp.f32 %v2797_v38 }
 0xb59   : > { %v2794_v10 = vpop.xlane.xlu1 %2793 }
 0xb5a   : > { %4626 = vrcp.f32 %v2794_v10 }
 0xb60   : > { %v2803_v13 = vpop.xlane.xlu0 %2802 }
 0xb62   : > { %v2800_v11 = vpop.xlane.xlu1 %2799 }
 0xb63   : > { %4628 = vrcp.f32 %v2800_v11  ;;  %v4625_v14 = vpop.eup %4624 }
 0xb64   : > { %v2817_v19 = vmul.f32 %v4625_v14, %v5577_v39  ;;  %4630 = vrcp.f32 %v2803_v13  ;;  %v3228_v39 = vld [vmem:[#allocation9 + $0x40] sm:$0xff] }
 0xb65   : > { %v2809_v9 = vpop.xlane.xlu0 %2808 }
 0xb66   : > { %4632 = vrcp.f32 %v2809_v9  ;;  %v3381_v9 = vld [vmem:[#allocation10 + $0xe0] sm:$0xff] }
 0xb67   : > { %v4627_v12 = vpop.eup %4626 }
 0xb68   : > { %v2815_v16 = vmul.f32 %v4627_v12, %v4611_v43  ;;  %v3384_v12 = vld [vmem:[#allocation10 + $0xf8] sm:$0xff] }
 0xb69   : > { %v3098_v20 = vpop.permute.xlu0 %3097 }
 0xb6a   : > { %4387 = vmatprep.mubr.msk.f32.mxu1 %vm1074_vm0, %v2815_v16  ;;  %v3383_v16 = vld [vmem:[#allocation10 + $0xf0] sm:$0xff] }
 0xb6b   : > { %4388 = vmatmul.mubr.msk.f32.vlgmr.msra.gmra.mxu1 %vm1074_vm0, %v2817_v19  ;;  %v3382_v19 = vld [vmem:[#allocation10 + $0xe8] sm:$0xff] }
 0xb6c   : > { %4402 = vmatpush3.msra.mxu1 %v3104_v58 }
 0xb6d   : > { %4403 = vmatprep.subr.mxu1 %v3102_v61 }
 0xb6e   : > { %4404 = vmatpush3.msra.mxu1 %v3102_v61 }
 0xb6f   : > { %4405 = vmatprep.subr.mxu1 %v3100_v63 }
 0xb70   : > { %v4629_v15 = vpop.eup %4628  ;;  %4406 = vmatpush3.msra.mxu1 %v3100_v63 }
 0xb71   : > { %4407 = vmatprep.subr.mxu1 %v3098_v20  ;;  %v2819_v1 = vmul.f32 %v4629_v15, %v5586_v47  ;;  %v4631_v23 = vpop.eup %4630  ;;  %v3222_v47 = vld [vmem:[#allocation9 + $0x10] sm:$0xff]  ;;  %v3380_v15 = vld [vmem:[#allocation10 + $0xd8] sm:$0xff] }
 0xb72   : > { %4408 = vmatpush3.msra.mxu1 %v3098_v20  ;;  %v2821_v25 = vmul.f32 %v4631_v23, %v5582_v45  ;;  %v3223_v45 = vld [vmem:[#allocation9 + $0x18] sm:$0xff]  ;;  %v3379_v20 = vld [vmem:[#allocation10 + $0xd0] sm:$0xff] }
 0xb73   : > { %4398 = vmatprep.mubr.msk.f32.mxu0 %vm1074_vm0, %v2819_v1  ;;  %v4633_v26 = vpop.eup %4632  ;;  %3397 = vmatprep.subr.mxu1 %v3384_v12  ;;  %v3377_v1 = vld [vmem:[#allocation10 + $0xc0] sm:$0xff]  ;;  %v3483_v12 = vld [vmem:[#allocation12 + $0x28] sm:$0xff] }
 0xb74   : > { %v2825_v18 = vmul.f32 %v4633_v26, %v5590_v49 }
 0xb97   : > { %v2806_v21 = vpop.xlane.xlu1 %2805 }
 0xb98   : > { %4634 = vrcp.f32 %v2806_v21 }
 0xb9b   : > { %v3005_v24 = vpop.permute.xlu1 %3004 }
 0xb9c   : > { %4396 = vmatprep.subr.mxu0 %v3005_v24 }
 0xb9d   : > { %4397 = vmatpush3.msra.mxu0 %v3005_v24 }
 0xb9e   : > { %4399 = vmatmul.mubr.msk.f32.vlgmr.msra.gmra.mxu0 %vm1074_vm0, %v2821_v25  ;;  %4412 = vmatprep.subr.mxu0 %v3235_v22 }
 0xb9f   : > { %4413 = vmatpush3.msra.mxu0 %v3235_v22  ;;  %v3375_v22 = vld [vmem:[#allocation10 + $0xb0] sm:$0xff] }
 0xba0   : > { %4414 = vmatprep.subr.mxu0 %v3234_v28 }
 0xba1   : > { %4415 = vmatpush3.msra.mxu0 %v3234_v28  ;;  %v3374_v28 = vld [vmem:[#allocation10 + $0xa8] sm:$0xff] }
 0xba2   : > { %4416 = vmatprep.subr.mxu0 %v3233_v29 }
 0xba3   : > { %4417 = vmatpush3.msra.mxu0 %v3233_v29  ;;  %v3373_v29 = vld [vmem:[#allocation10 + $0xa0] sm:$0xff] }
 0xba4   : > { %4418 = vmatprep.subr.mxu0 %v3232_v30 }
 0xba5   : > { %v4635_v27 = vpop.eup %4634  ;;  %4419 = vmatpush3.msra.mxu0 %v3232_v30  ;;  %v3372_v30 = vld [vmem:[#allocation10 + $0x98] sm:$0xff] }
 0xba6   : > { %v2823_v17 = vmul.f32 %v4635_v27, %v4619_v60  ;;  %4420 = vmatprep.subr.mxu0 %v3231_v33 }
 0xba7   : > { %4421 = vmatpush3.msra.mxu0 %v3231_v33  ;;  %v3370_v33 = vld [vmem:[#allocation10 + $0x88] sm:$0xff] }
 0xba8   : > { %4409 = vmatprep.mubr.msk.f32.mxu1 %vm1074_vm0, %v2823_v17  ;;  %4422 = vmatprep.subr.mxu0 %v3230_v35 }
 0xba9   : > { %4410 = vmatmul.mubr.msk.f32.vlgmr.msra.gmra.mxu1 %vm1074_vm0, %v2825_v18  ;;  %4423 = vmatpush3.msra.mxu0 %v3230_v35  ;;  %v3376_v18 = vld [vmem:[#allocation10 + $0xb8] sm:$0xff] }
 0xbaa   : > { %3461 = vmatprep.mubr.f32.mxu1 %v4857_v57  ;;  %4424 = vmatprep.subr.mxu0 %v3229_v37  ;;  %v3368_v35 = vld [vmem:[#allocation10 + $0x78] sm:$0xff] }
 0xbab   : > { %4425 = vmatpush3.msra.mxu0 %v3229_v37  ;;  %3398 = vmatpush1.msra.mxu1 %v3383_v16  ;;  %v3366_v37 = vld [vmem:[#allocation10 + $0x68] sm:$0xff]  ;;  %v3498_v16 = vld [vmem:[#allocation12 + $0xa0] sm:$0xff] }
 0xbac   : > { %4426 = vmatprep.subr.mxu0 %v3228_v39  ;;  %3399 = vmatprep.subr.mxu1 %v3382_v19  ;;  %v3482_v19 = vld [vmem:[#allocation12 + $0x20] sm:$0xff] }
 0xbad   : > { %4427 = vmatpush3.msra.mxu0 %v3228_v39  ;;  %3400 = vmatpush1.msra.mxu1 %v3381_v9  ;;  %v3365_v39 = vld [vmem:[#allocation10 + $0x60] sm:$0xff] }
 0xbae   : > { %4428 = vmatprep.subr.mxu0 %v3227_v40  ;;  %3401 = vmatprep.subr.mxu1 %v3380_v15 }
 0xbaf   : > { %4429 = vmatpush3.msra.mxu0 %v3227_v40  ;;  %3402 = vmatpush1.msra.mxu1 %v3379_v20  ;;  %v3364_v40 = vld [vmem:[#allocation10 + $0x58] sm:$0xff] }
 0xbb0   : > { %4430 = vmatprep.subr.mxu0 %v3226_v41 }
 0xbb1   : > { %4431 = vmatpush3.msra.mxu0 %v3226_v41  ;;  %v3363_v41 = vld [vmem:[#allocation10 + $0x50] sm:$0xff] }
 0xbb2   : > { %4432 = vmatprep.subr.mxu0 %v3225_v42 }
 0xbb3   : > { %4433 = vmatpush3.msra.mxu0 %v3225_v42  ;;  %v3362_v42 = vld [vmem:[#allocation10 + $0x48] sm:$0xff] }
 0xbb4   : > { %4434 = vmatprep.subr.mxu0 %v3224_v44 }
 0xbb5   : > { %4435 = vmatpush3.msra.mxu0 %v3224_v44  ;;  %v3360_v44 = vld [vmem:[#allocation10 + $0x38] sm:$0xff] }
 0xbb6   : > { %4436 = vmatprep.subr.mxu0 %v3223_v45 }
 0xbb7   : > { %4437 = vmatpush3.msra.mxu0 %v3223_v45  ;;  %v3359_v45 = vld [vmem:[#allocation10 + $0x30] sm:$0xff] }
 0xbb8   : > { %4438 = vmatprep.subr.mxu0 %v3222_v47 }
 0xbb9   : > { %4439 = vmatpush3.msra.mxu0 %v3222_v47  ;;  %v3357_v47 = vld [vmem:[#allocation10 + $0x20] sm:$0xff] }
 0xbba   : > { %4440 = vmatprep.subr.mxu0 %v3221_v51 }
 0xbbb   : > { %4441 = vmatpush3.msra.mxu0 %v3221_v51  ;;  %v3353_v51 = vld [vmem:[#allocation10] sm:$0xff] }
 0xbbc   : > { %4442 = vmatprep.subr.mxu0 %v3220_v52 }
 0xbbd   : > { %4443 = vmatpush3.msra.mxu0 %v3220_v52  ;;  %v3509_v52 = vld [vmem:[#allocation12 + $0xf8] sm:$0xff] }
 0xbbe   : > { %4049 = vmatprep.subr.mxu0 %v3509_v52 }
 0xc11   : > { %v4378_v43 = vpop.f32.mrf.mxu0 }
 0xc13   : > { %v2898_v46 = vpop.f32.mrf.mxu0 }
 0xc2b   : > { %v4389_v31 = vpop.f32.mrf.mxu1 }
 0xc2d   : > { %v2995_v34 = vpop.f32.mrf.mxu1 }
 0xc2e   : > { %v4549_v36 = vpack.i.bf16 %v4389_v31, %v2995_v34  ;;  %v3371_v31 = vld [vmem:[#allocation10 + $0x90] sm:$0xff]  ;;  %v3369_v34 = vld [vmem:[#allocation10 + $0x80] sm:$0xff] }
 0xc30   : > { %4550 = vrot.lane.b32.xlu1 %v4549_v36, %s4860_s3  ;;  %v3367_v36 = vld [vmem:[#allocation10 + $0x70] sm:$0xff] }
 0xc5e   : > { %v4400_v48 = vpop.f32.mrf.mxu0 }
 0xc60   : > { %v3088_v49 = vpop.f32.mrf.mxu0 }
 0xc61   : > { %v4554_v50 = vpack.i.bf16 %v4400_v48, %v3088_v49  ;;  %v3356_v48 = vld [vmem:[#allocation10 + $0x18] sm:$0xff]  ;;  %v3355_v49 = vld [vmem:[#allocation10 + $0x10] sm:$0xff] }
 0xc63   : > { %4555 = vrot.lane.b32.xlu0 %v4554_v50, %s4859_s30  ;;  %v3354_v50 = vld [vmem:[#allocation10 + $0x8] sm:$0xff] }
 0xc69   : > { %v4411_v32 = vpop.f32.mrf.mxu1 }
 0xc6b   : > { %v3181_v53 = vpop.f32.mrf.mxu1 }
 0xc6c   : > { %v4559_v55 = vpack.i.bf16 %v4411_v32, %v3181_v53  ;;  %v3493_v32 = vld [vmem:[#allocation12 + $0x78] sm:$0xff]  ;;  %v3508_v53 = vld [vmem:[#allocation12 + $0xf0] sm:$0xff] }
 0xc6e   : > { %4560 = vrot.lane.b32.xlu1 %v4559_v55, %s4858_s28  ;;  %v3492_v55 = vld [vmem:[#allocation12 + $0x70] sm:$0xff] }
 0xca2   : > { %v4551_v58 = vpop.permute.xlu1 %4550 }
 0xca3   : > { %v4553_v60 = vunpack.i.h.bf16 %v4551_v58  ;;  %v4552_v0 = vunpack.i.l.bf16 %v4551_v58  ;;  %v3507_v58 = vld [vmem:[#allocation12 + $0xe8] sm:$0xff] }
 0xca5   : > { %v3215_v2 = vsel %vm1074_vm0, %v4378_v43, %v4553_v60  ;;  %v3214_v5 = vsel %vm1074_vm0, %v2898_v46, %v4552_v0  ;;  %v3361_v43 = vld [vmem:[#allocation10 + $0x40] sm:$0xff]  ;;  %v3358_v46 = vld [vmem:[#allocation10 + $0x28] sm:$0xff] }
 0xca6   : > { %v3506_v60 = vld [vmem:[#allocation12 + $0xe0] sm:$0xff] }
 0xca7   : > { %v3490_v0 = vld [vmem:[#allocation12 + $0x60] sm:$0xff] }
 0xcd5   : > { %v4556_v59 = vpop.permute.xlu0 %4555 }
 0xcd6   : > { %v4558_v61 = vunpack.i.h.bf16 %v4556_v59  ;;  %v4557_v62 = vunpack.i.l.bf16 %v4556_v59  ;;  %v3491_v59 = vld [vmem:[#allocation12 + $0x68] sm:$0xff] }
 0xcd8   : > { %v3216_v6 = vsel %vm1902_vm2, %v3214_v5, %v4557_v62  ;;  %v3217_v7 = vsel %vm1902_vm2, %v3215_v2, %v4558_v61  ;;  %v3505_v61 = vld [vmem:[#allocation12 + $0xd8] sm:$0xff]  ;;  %v3488_v2 = vld [vmem:[#allocation12 + $0x50] sm:$0xff]  ;;  %v3502_v5 = vld [vmem:[#allocation12 + $0xc0] sm:$0xff] }
 0xcd9   : > { %v3489_v62 = vld [vmem:[#allocation12 + $0x58] sm:$0xff] }
 0xce0   : > { %v4561_v63 = vpop.permute.xlu1 %4560 }
 0xce1   : > { %v4563_v3 = vunpack.i.h.bf16 %v4561_v63  ;;  %v4562_v4 = vunpack.i.l.bf16 %v4561_v63  ;;  %v3504_v63 = vld [vmem:[#allocation12 + $0xd0] sm:$0xff] }
 0xce3   : > { %v3218_v8 = vsel %vm1905_vm3, %v3216_v6, %v4562_v4  ;;  %v3219_v38 = vsel %vm1905_vm3, %v3217_v7, %v4563_v3  ;;  %v3503_v3 = vld [vmem:[#allocation12 + $0xc8] sm:$0xff]  ;;  %v3486_v6 = vld [vmem:[#allocation12 + $0x40] sm:$0xff]  ;;  %v3501_v7 = vld [vmem:[#allocation12 + $0xb8] sm:$0xff] }
 0xce4   : > { %4444 = vmatprep.mubr.f32.mxu0 %v3218_v8  ;;  %v3487_v4 = vld [vmem:[#allocation12 + $0x48] sm:$0xff]  ;;  %v3485_v8 = vld [vmem:[#allocation12 + $0x38] sm:$0xff] }
 0xce5   : > { %4445 = vmatmul.mubr.f32.vlgmr.msra.gmra.mxu0 %v3219_v38  ;;  %v3500_v38 = vld [vmem:[#allocation12 + $0xb0] sm:$0xff] }
 0xce6   : > { %4050 = vmatpush3.msra.mxu0 %v3493_v32 }
 0xce7   : > { %4051 = vmatprep.subr.mxu0 %v3508_v53 }
 0xce8   : > { %4052 = vmatpush3.msra.mxu0 %v3492_v55 }
 0xce9   : > { %4053 = vmatprep.subr.mxu0 %v3507_v58 }
 0xcea   : > { %4054 = vmatpush3.msra.mxu0 %v3491_v59 }
 0xceb   : > { %4055 = vmatprep.subr.mxu0 %v3506_v60 }
 0xcec   : > { %4056 = vmatpush3.msra.mxu0 %v3490_v0 }
 0xced   : > { %4057 = vmatprep.subr.mxu0 %v3505_v61  ;;  %v3849_v61 = vld [vmem:[%s5686_s20] ss:$0 sm:$0xff] }
 0xcee   : > { %4058 = vmatpush3.msra.mxu0 %v3489_v62 }
 0xcef   : > { %4059 = vmatprep.subr.mxu0 %v3504_v63 }
 0xcf0   : > { %4060 = vmatpush3.msra.mxu0 %v3488_v2 }
 0xcf1   : > { %4061 = vmatprep.subr.mxu0 %v3503_v3 }
 0xcf2   : > { %4062 = vmatpush3.msra.mxu0 %v3487_v4 }
 0xcf3   : > { %4063 = vmatprep.subr.mxu0 %v3502_v5 }
 0xcf4   : > { %4064 = vmatpush3.msra.mxu0 %v3486_v6 }
 0xcf5   : > { %4065 = vmatprep.subr.mxu0 %v3501_v7 }
 0xcf6   : > { %4066 = vmatpush3.msra.mxu0 %v3485_v8 }
 0xcf7   : > { %4067 = vmatprep.subr.mxu0 %v3500_v38 }
 0xda5   : > { %v4446_v10 = vpop.f32.mrf.mxu0 }
 0xda6   : > { %v5625_v11 = vadd.f32 %v4446_v10, %v5381_v54  ;;  %v3378_v54 = vld [vmem:[#allocation10 + $0xc8] sm:$0xff]  ;;  %v3484_v10 = vld [vmem:[#allocation12 + $0x30] sm:$0xff] }
 0xda7   : > { %v3302_v13 = vpop.f32.mrf.mxu0  ;;  %3403 = vmatprep.subr.mxu1 %v3378_v54  ;;  %4068 = vmatpush3.msra.mxu0 %v3484_v10 }
 0xda8   : > { %v5628_v14 = vadd.f32 %v3302_v13, %v5384_v56  ;;  %3317 = vadd.xlane.f32.xlu1 %v5625_v11  ;;  %3404 = vmatpush1.msra.mxu1 %v3377_v1  ;;  %v3499_v13 = vld [vmem:[#allocation12 + $0xa8] sm:$0xff] }
 0xda9   : > { %3405 = vmatprep.subr.mxu1 %v3376_v18  ;;  %4069 = vmatprep.subr.mxu0 %v3499_v13 }
 0xdaa   : > { %3315 = vadd.xlane.f32.xlu0 %v5628_v14  ;;  %3406 = vmatpush1.msra.mxu1 %v3375_v22 }
 0xdab   : > { %3407 = vmatprep.subr.mxu1 %v3374_v28  ;;  %4070 = vmatpush3.msra.mxu0 %v3483_v12 }
 0xdac   : > { %3408 = vmatpush1.msra.mxu1 %v3373_v29  ;;  %4071 = vmatprep.subr.mxu0 %v3498_v16 }
 0xdad   : > { %3409 = vmatprep.subr.mxu1 %v3372_v30  ;;  %4072 = vmatpush3.msra.mxu0 %v3482_v19 }
 0xdae   : > { %3410 = vmatpush1.msra.mxu1 %v3371_v31  ;;  %v3497_v31 = vld [vmem:[#allocation12 + $0x98] sm:$0xff] }
 0xdaf   : > { %3411 = vmatprep.subr.mxu1 %v3370_v33  ;;  %4073 = vmatprep.subr.mxu0 %v3497_v31  ;;  %v3481_v33 = vld [vmem:[#allocation12 + $0x18] sm:$0xff] }
 0xdb0   : > { %3412 = vmatpush1.msra.mxu1 %v3369_v34  ;;  %4074 = vmatpush3.msra.mxu0 %v3481_v33  ;;  %v3480_v34 = vld [vmem:[#allocation12 + $0x10] sm:$0xff] }
 0xdb1   : > { %3413 = vmatprep.subr.mxu1 %v3368_v35  ;;  %v3495_v35 = vld [vmem:[#allocation12 + $0x88] sm:$0xff] }
 0xdb2   : > { %3414 = vmatpush1.msra.mxu1 %v3367_v36  ;;  %v3479_v36 = vld [vmem:[#allocation12 + $0x8] sm:$0xff] }
 0xdb3   : > { %3415 = vmatprep.subr.mxu1 %v3366_v37  ;;  %v3494_v37 = vld [vmem:[#allocation12 + $0x80] sm:$0xff] }
 0xdb4   : > { %3416 = vmatpush1.msra.mxu1 %v3365_v39  ;;  %v3387_v39 = vlaneseq }
 0xdb5   : > { %3417 = vmatprep.subr.mxu1 %v3364_v40 }
 0xdb6   : > { %3418 = vmatpush1.msra.mxu1 %v3363_v41  ;;  %v3385_v41 = vld [vmem:[%s5684_s18] sm:$0x3] }
 0xdb7   : > { %3419 = vmatprep.subr.mxu1 %v3362_v42 }
 0xdb8   : > { %3420 = vmatpush1.msra.mxu1 %v3361_v43 }
 0xdb9   : > { %3421 = vmatprep.subr.mxu1 %v3360_v44 }
 0xdba   : > { %3422 = vmatpush1.msra.mxu1 %v3359_v45 }
 0xdbb   : > { %3423 = vmatprep.subr.mxu1 %v3358_v46 }
 0xdbc   : > { %3424 = vmatpush1.msra.mxu1 %v3357_v47 }
 0xdbd   : > { %3425 = vmatprep.subr.mxu1 %v3356_v48 }
 0xdbe   : > { %3426 = vmatpush1.msra.mxu1 %v3355_v49 }
 0xdbf   : > { %3427 = vmatprep.subr.mxu1 %v3354_v50 }
 0xdc0   : > { %3428 = vmatpush1.msra.mxu1 %v3353_v51 }
 0xe31   : > { %v3318_v56 = vpop.xlane.xlu1 %3317 }
 0xe32   : > { %v3320_v23 = vmul.f32 0.0078125, %v3318_v56 }
 0xe33   : > { %v3316_v21 = vpop.xlane.xlu0 %3315 }
 0xe34   : > { %v3319_v24 = vmul.f32 0.0078125, %v3316_v21  ;;  %v5636_v26 = vsub.f32 %v5625_v11, %v3320_v23  ;;  %v3847_v23 = vld [vmem:[%s5681_s15] ss:$0 sm:$0xff] }
 0xe36   : > { %v5633_v25 = vsub.f32 %v5628_v14, %v3319_v24  ;;  %v3324_v17 = vmul.f32 %v5636_v26, %v5636_v26 }
 0xe38   : > { %v3323_v27 = vmul.f32 %v5633_v25, %v5633_v25 }
 0xe3a   : > { %3325 = vadd.xlane.f32.xlu0 %v3323_v27  ;;  %v3848_v27 = vld [vmem:[%s5682_s16] ss:$0 sm:$0xff] }
 0xe3e   : > { %3327 = vadd.xlane.f32.xlu0 %v3324_v17 }
 0xec3   : > { %v3326_v9 = vpop.xlane.xlu0 %3325 }
 0xec4   : > { %v3329_v15 = vmul.f32 0.0078125, %v3326_v9 }
 0xec6   : > { %v3331_v20 = vadd.f32 1e-05, %v3329_v15 }
 0xec7   : > { %v3328_v54 = vpop.xlane.xlu0 %3327 }
 0xec8   : > { %4636 = vrsqrt.f32 %v3331_v20  ;;  %v3330_v1 = vmul.f32 0.0078125, %v3328_v54 }
 0xeca   : > { %v3332_v56 = vadd.f32 1e-05, %v3330_v1 }
 0xecc   : > { %4638 = vrsqrt.f32 %v3332_v56 }
 0xed5   : > { %v4637_v21 = vpop.eup %4636 }
 0xed6   : > { %v3335_v24 = vmul.f32 %v4637_v21, %v5633_v25  ;;  %v3496_v25 = vld [vmem:[#allocation12 + $0x90] sm:$0xff] }
 0xed7   : > { %4075 = vmatprep.subr.mxu0 %v3496_v25 }
 0xed8   : > { %v3343_v17 = vmul.f32 %v3847_v23, %v3335_v24  ;;  %4076 = vmatpush3.msra.mxu0 %v3480_v34 }
 0xed9   : > { %v4639_v18 = vpop.eup %4638  ;;  %4077 = vmatprep.subr.mxu0 %v3495_v35 }
 0xeda   : > { %v3351_v22 = vadd.f32 %v3848_v27, %v3343_v17  ;;  %v3336_v28 = vmul.f32 %v4639_v18, %v5636_v26  ;;  %4078 = vmatpush3.msra.mxu0 %v3479_v36  ;;  %v3478_v26 = vld [vmem:[#allocation12] sm:$0xff] }
 0xedb   : > { %4079 = vmatprep.subr.mxu0 %v3494_v37 }
 0xedc   : > { %3462 = vmatmul.mubr.f32.vlgmr.msra.gmra.mxu1 %v3351_v22  ;;  %v3344_v29 = vmul.f32 %v3847_v23, %v3336_v28  ;;  %4080 = vmatpush3.msra.mxu0 %v3478_v26 }
 0xedd   : > { %3467 = vmatprep.mubr.f32.mxu1 %v4857_v57  ;;  %v3388_v57 = vshrl.u32 %v3387_v39, 7 }
 0xede   : > { %v3352_v30 = vadd.f32 %v3848_v27, %v3344_v29 }
 0xedf   : > { %v3389_v40 = vsub.s32 0, %v3388_v57  ;;  %v3393_v42 = vsub.s32 1, %v3388_v57 }
 0xee0   : > { %3468 = vmatmul.mubr.f32.gmra.mxu1 %v3352_v30 }
 0xee1   : > { %v3390_v43 = vrot.slane %v3385_v41, %v3389_v40  ;;  %v3394_v44 = vrot.slane %v3385_v41, %v3393_v42 }
 0xf9c   : > { %v3463_v45 = vpop.f32.mrf.mxu1 }
 0xf9d   : > { %v3464_v46 = vadd.f32 %v3463_v45, %v3390_v43 }
 0xf9e   : > { %v3465_v47 = vpop.f32.mrf.mxu1 }
 0xf9f   : > { %v3466_v48 = vadd.f32 %v3465_v47, %v3394_v44  ;;  %v3474_v51 = vmax.f32 %v3464_v46, 0.0 }
 0xfa0   : > { %v3469_v49 = vpop.f32.mrf.mxu1 }
 0xfa1   : > { %v3475_v50 = vmax.f32 %v3466_v48, 0.0  ;;  %v3470_v52 = vadd.f32 %v3469_v49, %v3390_v43 }
 0xfa2   : > { %v3471_v32 = vpop.f32.mrf.mxu1 }
 0xfa3   : > { %v3472_v53 = vadd.f32 %v3471_v32, %v3394_v44  ;;  %3574 = vmatprep.mubr.f32.mxu0 %v3475_v50  ;;  %v3476_v58 = vmax.f32 %v3470_v52, 0.0 }
 0xfa4   : > { %3575 = vmatmul.mubr.f32.vlgmr.msra.gmra.mxu0 %v3474_v51 }
 0xfa5   : > { %v3477_v55 = vmax.f32 %v3472_v53, 0.0 }
 0xfa7   : > { %3579 = vmatprep.mubr.f32.mxu0 %v3477_v55 }
 0xfa8   : > { %3580 = vmatmul.mubr.f32.gmra.mxu0 %v3476_v58 }
0x1064   : > { %v4081_v59 = vpop.f32.mrf.mxu0 }
0x1066   : > { %v4082_v60 = vpop.f32.mrf.mxu0 }
0x1067   : > { %v4083_v0 = vadd.f32 %v4082_v60, %v4081_v59 }
0x1068   : > { %v4084_v62 = vpop.f32.mrf.mxu0 }
0x1069   : > { %v3585_v63 = vadd.f32 %v4083_v0, %v5628_v14 }
0x106a   : > { %v4085_v2 = vpop.f32.mrf.mxu0 }
0x106b   : > { %v3594_v3 = vadd.f32 %v3849_v61, %v3585_v63  ;;  %v4086_v4 = vadd.f32 %v4085_v2, %v4084_v62 }
0x106d   : > { %3596 = vst [vmem:[%s818_s27] sm:$0xff] %v3594_v3  ;;  %v3586_v5 = vadd.f32 %v4086_v4, %v5625_v11 }
0x106f   : > { %v3595_v6 = vadd.f32 %v3849_v61, %v3586_v5 }
0x1071   : > { %3597 = vst [vmem:[%s818_s27 + $0x8] sm:$0xff] %v3595_v6 }
0x1072 PF: > { %s35_s2 = sadd.s32 1, %s4844_s2  }
0x1073   : > { %p32_p2 = scmp.ge.s32.totalorder %s35_s2, 4  }
0x1075   :  { %34 = sbr.rel (!%p32_p2) target bundleno = 11 (0xb), region = 172 }
0x107a   :  { %3619 = vsyncpa [#allocation3], 1 }
0x107b   :  { %3621 = vsyncpa [#allocation3 + $0x1], 1 }
0x107c   :  { %3622 = vsyncpa [#allocation5], 1 }
0x107d   :  { %3623 = vsyncpa [#allocation8], 1 }
0x107e   :  { %3624 = vsyncpa [#allocation11], 1 }

</bundles_post_ra>
